<compile_context>
chip_gen: v5e
topology: v5e:2x2
jax: 0.10.0
libtpu: 0.0.40
codegen_flags: <defaults>
</compile_context>

<pallas_src>
import math
from functools import partial

import jax
import jax.numpy as jnp
from jax.experimental import pallas as pl
from jax.experimental.pallas import tpu as pltpu

# ----------------------------- configuration --------------------------------
SEQ = 2            # (s)equence
TOK = 16           # (t)okens per sequence
D_MODEL = 128      # (m)odel dim        -- lane-dense (multiple of 128)
D_FF = 256         # expert hidden dim  -- lane-dense (multiple of 128)
NUM_EXPERTS = 4
K = 1              # top-1 gate
CAPACITY_FACTOR = 2.0
S_TOTAL = SEQ * TOK
CAPACITY = int(math.ceil(S_TOTAL / NUM_EXPERTS * CAPACITY_FACTOR))   # 16, multiple of 8
TOKEN_TILE = 8     # combine-kernel token tile (multiple of 8, divides S_TOTAL)


# ------------------- Kernel A: dispatch gather + expert FFN ------------------
def expert_ffn_kernel(gidx_ref, cnt_ref,            # scalar prefetch (SMEM)
                      x_hbm,                        # (S, M) f32, HBM (pl.ANY)
                      w1_ref, b1_ref, w2_ref, b2_ref,   # per-expert weight tiles (VMEM)
                      y_ref,                        # (C, M) f32 output block (expert e)
                      disp_ref, sem_ref):           # scratch: (C, M) f32, DMA sems (C,)
    e = pl.program_id(0)
    C, M = disp_ref.shape
    cnt = cnt_ref[e]

    @pl.when(cnt == 0)
    def _():
        # No tokens routed here: skip gather + FFN entirely, emit zeros.
        y_ref[...] = jnp.zeros_like(y_ref)

    @pl.when(cnt > 0)
    def _():
        # Dispatch: per-slot DMA row gather from HBM, addressed by SMEM slot->token ids
        # (empty slots are clamped to token 0 by the gate glue; never combined).
        for j in range(C):
            pltpu.make_async_copy(
                x_hbm.at[pl.ds(gidx_ref[e, j], 1), :],
                disp_ref.at[pl.ds(j, 1), :],
                sem_ref.at[j]).start()
        for j in range(C):
            pltpu.make_async_copy(
                x_hbm.at[pl.ds(0, 1), :],
                disp_ref.at[pl.ds(j, 1), :],
                sem_ref.at[j]).wait()

        # Expert FFN: bf16 MXU inputs, f32 accumulation, bias/ReLU in f32.
        xe = disp_ref[...].astype(jnp.bfloat16)                       # (C, M)
        h = jnp.dot(xe, w1_ref[...],
                    preferred_element_type=jnp.float32) + b1_ref[...]  # (C, F) f32
        h = jnp.maximum(h, 0.0)
        ye = jnp.dot(h.astype(jnp.bfloat16), w2_ref[...],
                     preferred_element_type=jnp.float32) + b2_ref[...]  # (C, M) f32
        y_ref[...] = ye


def expert_ffn(x2d, gather_idx, counts, w1, b1, w2, b2, *, capacity):
    """x2d: (S,M) f32 in HBM; w1/w2 bf16, b1/b2 f32 per expert. Returns (E,C,M) f32."""
    S, M = x2d.shape
    E, _, F = w1.shape
    C = capacity

    flops = E * (2 * C * M * F + 2 * C * F * M)
    bytes_accessed = int(E * C * M * 4 + w1.size * 2 + w2.size * 2
                         + b1.size * 4 + b2.size * 4 + E * C * M * 4)

    return pl.pallas_call(
        expert_ffn_kernel,
        out_shape=jax.ShapeDtypeStruct((E, C, M), jnp.float32),
        grid_spec=pltpu.PrefetchScalarGridSpec(
            num_scalar_prefetch=2,                     # gather_idx, counts -> SMEM
            grid=(E,),
            in_specs=[
                pl.BlockSpec(memory_space=pl.ANY),                       # x stays in HBM
                pl.BlockSpec((None, M, F), lambda e, *_: (e, 0, 0)),     # w1[e] (bf16)
                pl.BlockSpec((None, 1, F), lambda e, *_: (e, 0, 0)),     # b1[e]
                pl.BlockSpec((None, F, M), lambda e, *_: (e, 0, 0)),     # w2[e] (bf16)
                pl.BlockSpec((None, 1, M), lambda e, *_: (e, 0, 0)),     # b2[e]
            ],
            out_specs=pl.BlockSpec((None, C, M), lambda e, *_: (e, 0, 0)),
            scratch_shapes=[pltpu.VMEM((C, M), jnp.float32),
                            pltpu.SemaphoreType.DMA((C,))],
        ),
        compiler_params=pltpu.CompilerParams(
            dimension_semantics=("parallel",),
            vmem_limit_bytes=32 * 1024 * 1024),
        cost_estimate=pl.CostEstimate(flops=flops, transcendentals=0,
                                      bytes_accessed=bytes_accessed),
    )(gather_idx, counts, x2d, w1, b1, w2, b2)


# ---------------- Kernel B: weighted combine (gather by slot id) -------------
def combine_kernel(slot_ref,                         # scalar prefetch: (S,) token->slot
                   cw_ref,                           # (Ts, 1) f32 gate weight block
                   y_hbm,                            # (E*C, M) f32, HBM (pl.ANY)
                   o_ref,                            # (Ts, M) f32 output block
                   buf_ref, sem_ref):                # scratch: (Ts, M) f32, DMA sems (Ts,)
    t = pl.program_id(0)
    Ts, M = buf_ref.shape
    base = t * Ts
    # Combine: per-token DMA row gather from the slot-major expert outputs.
    for j in range(Ts):
        pltpu.make_async_copy(
            y_hbm.at[pl.ds(slot_ref[base + j], 1), :],
            buf_ref.at[pl.ds(j, 1), :],
            sem_ref.at[j]).start()
    for j in range(Ts):
        pltpu.make_async_copy(
            y_hbm.at[pl.ds(0, 1), :],
            buf_ref.at[pl.ds(j, 1), :],
            sem_ref.at[j]).wait()
    # Gate weight folded into the gathered store (0 for dropped tokens -> exact 0 row).
    o_ref[...] = cw_ref[...] * buf_ref[...]


def combine(y_slots, slot_id, combine_w, *, token_tile):
    """y_slots: (E*C, M) f32; slot_id: (S,) int32; combine_w: (S,) f32. Returns (S, M)."""
    EC, M = y_slots.shape
    S = slot_id.shape[0]
    Ts = token_tile
    cw2d = combine_w.reshape(S, 1).astype(jnp.float32)

    return pl.pallas_call(
        combine_kernel,
        out_shape=jax.ShapeDtypeStruct((S, M), jnp.float32),
        grid_spec=pltpu.PrefetchScalarGridSpec(
            num_scalar_prefetch=1,                    # slot_id -> SMEM
            grid=(S // Ts,),
            in_specs=[
                pl.BlockSpec((Ts, 1), lambda t, *_: (t, 0)),   # gate weights
                pl.BlockSpec(memory_space=pl.ANY),             # expert outputs in HBM
            ],
            out_specs=pl.BlockSpec((Ts, M), lambda t, *_: (t, 0)),
            scratch_shapes=[pltpu.VMEM((Ts, M), jnp.float32),
                            pltpu.SemaphoreType.DMA((Ts,))],
        ),
        compiler_params=pltpu.CompilerParams(
            dimension_semantics=("parallel",),
            vmem_limit_bytes=32 * 1024 * 1024),
    )(slot_id, cw2d, y_slots)


# ------------------------------ gate (glue) ----------------------------------
def top1_gate(x2d, wg, capacity):
    """Deterministic top-1 gate with capacity dropping.

    Returns:
      combine_w:    (S,)  f32   gate probability, 0 for dropped tokens
      slot_id:      (S,)  int32 token -> flat (E*C) slot; dropped tokens clamped to 0
      gather_idx:   (E,C) int32 slot -> token; empty slots clamped to token 0
      counts:       (E,)  int32 number of tokens actually routed to each expert
      dispatch_mask:(E,C) int32 PyTorch-style mask (sentinel S*k marks empty slots)
    """
    S, _ = x2d.shape
    E = wg.shape[1]
    logits = x2d @ wg
    probs = jax.nn.softmax(logits, axis=-1)
    expert_idx = jnp.argmax(probs, axis=-1).astype(jnp.int32)            # (S,)
    gate_prob = jnp.max(probs, axis=-1)                                  # (S,)

    onehot = jax.nn.one_hot(expert_idx, E, dtype=jnp.int32)              # (S, E)
    pos_in_expert = (jnp.sum(jnp.cumsum(onehot, axis=0) * onehot, axis=-1)
                     - 1).astype(jnp.int32)                              # (S,)
    keep = pos_in_expert < capacity

    slot_id = jnp.where(keep, expert_idx * capacity + pos_in_expert,
                        0).astype(jnp.int32)                             # dropped -> 0
    combine_w = (gate_prob * keep.astype(gate_prob.dtype)).astype(jnp.float32)

    tok_idx = jnp.arange(S, dtype=jnp.int32)
    gather_idx = jnp.zeros((E, capacity), dtype=jnp.int32)
    gather_idx = gather_idx.at[expert_idx, pos_in_expert].set(tok_idx, mode='drop')
    counts = jnp.minimum(jnp.sum(onehot, axis=0), capacity).astype(jnp.int32)

    sentinel = S * K
    dispatch_mask = jnp.full((E, capacity), sentinel, dtype=jnp.int32)
    dispatch_mask = dispatch_mask.at[expert_idx, pos_in_expert].set(tok_idx, mode='drop')
    return combine_w, slot_id, gather_idx, counts, dispatch_mask


# --------------------------- MoE-EP forward ----------------------------------
def moe_ep_forward(x, params):
    """Mirrors MixtureOfExpertsEP.forward for expert_group_size == 1."""
    s, t, m = x.shape
    x2d = x.reshape(-1, m).astype(jnp.float32)                           # (S, M)
    combine_w, slot_id, gather_idx, counts, _ = top1_gate(x2d, params['wg'], CAPACITY)

    w1b = params['w1'].astype(jnp.bfloat16)
    w2b = params['w2'].astype(jnp.bfloat16)
    y = expert_ffn(x2d, gather_idx, counts, w1b, params['b1'], w2b, params['b2'],
                   capacity=CAPACITY)                                    # (E, C, M)
    out2d = combine(y.reshape(-1, m), slot_id, combine_w,
                    token_tile=TOKEN_TILE)                               # (S, M)
    return out2d.reshape(x.shape).astype(x.dtype)


# ------------------------- pure-JAX reference --------------------------------
def moe_ep_reference(x, params):
    """Faithful to the PyTorch index_select / scatter / einsum formulation."""
    s, t, m = x.shape
    x2d = x.reshape(-1, m).astype(jnp.float32)
    S = x2d.shape[0]
    combine_w, _, _, _, dispatch_mask = top1_gate(x2d, params['wg'], CAPACITY)
    C = CAPACITY
    gather = (dispatch_mask % S).reshape(-1)
    dispatched = x2d[gather].reshape(-1, C, m)
    w1b = params['w1'].astype(jnp.bfloat16)
    w2b = params['w2'].astype(jnp.bfloat16)
    h = jnp.einsum('ecm,emf->ecf', dispatched.astype(jnp.bfloat16), w1b,
                   preferred_element_type=jnp.float32) + params['b1']
    h = jnp.maximum(h, 0.0)
    eo = jnp.einsum('ecf,efm->ecm', h.astype(jnp.bfloat16), w2b,
                    preferred_element_type=jnp.float32) + params['b2']
    rerouted = jnp.zeros((S * K + 1, m), dtype=eo.dtype)
    rerouted = rerouted.at[dispatch_mask.reshape(-1)].set(eo.reshape(-1, m))
    rerouted = rerouted[:-1]                                             # (S, m)
    combined = combine_w[:, None] * rerouted
    return combined.reshape(x.shape).astype(x.dtype)


# --------------------------------- main ---------------------------------------
if __name__ == "__main__":
    key = jax.random.PRNGKey(0)
    k_x, k_g, k_w1, k_b1, k_w2, k_b2 = jax.random.split(key, 6)

    x = jax.random.normal(k_x, (SEQ, TOK, D_MODEL), dtype=jnp.float32)

    params = {
        'wg': jax.random.normal(k_g, (D_MODEL, NUM_EXPERTS), jnp.float32) * 0.1,
        'w1': jax.random.normal(k_w1, (NUM_EXPERTS, D_MODEL, D_FF), jnp.float32)
              * (1.0 / math.sqrt(D_MODEL)),
        'b1': jax.random.normal(k_b1, (NUM_EXPERTS, 1, D_FF), jnp.float32) * 0.01,
        'w2': jax.random.normal(k_w2, (NUM_EXPERTS, D_FF, D_MODEL), jnp.float32)
              * (1.0 / math.sqrt(D_FF)),
        'b2': jax.random.normal(k_b2, (NUM_EXPERTS, 1, D_MODEL), jnp.float32) * 0.01,
    }

    out = jax.jit(partial(moe_ep_forward, params=params))(x)
    out = jax.block_until_ready(out)

    ref = jax.block_until_ready(moe_ep_reference(x, params))
    assert out.shape == x.shape and out.dtype == x.dtype
    assert jnp.allclose(out, ref, atol=1e-3, rtol=1e-3), "mismatch vs reference"

    print("KERNEL_OK")
</pallas_src>

<mosaic_0001>
module attributes {stable_mosaic.version = 11 : i64} {
  func.func @combine_kernel(%arg0: i32, %arg1: memref<32xi32, #tpu.memory_space<smem>>, %arg2: memref<8x1xf32, #tpu.memory_space<vmem>>, %arg3: memref<64x128xf32, #tpu.memory_space<any>>, %arg4: memref<8x128xf32, #tpu.memory_space<vmem>>, %arg5: memref<8x128xf32, #tpu.memory_space<vmem>>, %arg6: memref<8x!tpu.dma_semaphore, #tpu.memory_space<semaphore_mem>>) attributes {dimension_semantics = [#tpu.dimension_semantics<parallel>], iteration_bounds = array<i64: 4>, scalar_prefetch = 1 : i64, scratch_operands = 2 : i64, tpu.core_type = #tpu.core_type<tc>, window_params = [{transform_indices = @transform_0, window_bounds = array<i64: 8, 1>}, {}, {transform_indices = @transform_2, window_bounds = array<i64: 8, 128>}]} {
    %c8_i32 = arith.constant 8 : i32
    %0 = arith.muli %arg0, %c8_i32 : i32
    %c0_i32 = arith.constant 0 : i32
    %1 = arith.addi %0, %c0_i32 : i32
    %2 = arith.index_cast %1 : i32 to index
    %3 = memref.load %arg1[%2] : memref<32xi32, #tpu.memory_space<smem>>
    %c0_i32_0 = arith.constant 0 : i32
    %c0_i32_1 = arith.constant 0 : i32
    %4 = tpu.memref_slice %arg3[%3, %c0_i32_1] : memref<64x128xf32, #tpu.memory_space<any>> -> memref<1x128xf32, #tpu.memory_space<any>>
    %c0_i32_2 = arith.constant 0 : i32
    %c0_i32_3 = arith.constant 0 : i32
    %5 = tpu.memref_slice %arg5[%c0_i32_2, %c0_i32_3] : memref<8x128xf32, #tpu.memory_space<vmem>> -> memref<1x128xf32, #tpu.memory_space<vmem>>
    %6 = tpu.memref_slice %arg6[%c0_i32_0] : memref<8x!tpu.dma_semaphore, #tpu.memory_space<semaphore_mem>> -> memref<1x!tpu.dma_semaphore, #tpu.memory_space<semaphore_mem>>
    %7 = tpu.memref_squeeze %6 : memref<1x!tpu.dma_semaphore, #tpu.memory_space<semaphore_mem>> -> memref<!tpu.dma_semaphore, #tpu.memory_space<semaphore_mem>>
    tpu.enqueue_dma source(%4 : memref<1x128xf32, #tpu.memory_space<any>>) target(%5 : memref<1x128xf32, #tpu.memory_space<vmem>>) target_semaphore(%7 : memref<!tpu.dma_semaphore, #tpu.memory_space<semaphore_mem>>)
    %c1_i32 = arith.constant 1 : i32
    %8 = arith.addi %0, %c1_i32 : i32
    %9 = arith.index_cast %8 : i32 to index
    %10 = memref.load %arg1[%9] : memref<32xi32, #tpu.memory_space<smem>>
    %c1_i32_4 = arith.constant 1 : i32
    %c0_i32_5 = arith.constant 0 : i32
    %11 = tpu.memref_slice %arg3[%10, %c0_i32_5] : memref<64x128xf32, #tpu.memory_space<any>> -> memref<1x128xf32, #tpu.memory_space<any>>
    %c1_i32_6 = arith.constant 1 : i32
    %c0_i32_7 = arith.constant 0 : i32
    %12 = tpu.memref_slice %arg5[%c1_i32_6, %c0_i32_7] : memref<8x128xf32, #tpu.memory_space<vmem>> -> memref<1x128xf32, #tpu.memory_space<vmem>>
    %13 = tpu.memref_slice %arg6[%c1_i32_4] : memref<8x!tpu.dma_semaphore, #tpu.memory_space<semaphore_mem>> -> memref<1x!tpu.dma_semaphore, #tpu.memory_space<semaphore_mem>>
    %14 = tpu.memref_squeeze %13 : memref<1x!tpu.dma_semaphore, #tpu.memory_space<semaphore_mem>> -> memref<!tpu.dma_semaphore, #tpu.memory_space<semaphore_mem>>
    tpu.enqueue_dma source(%11 : memref<1x128xf32, #tpu.memory_space<any>>) target(%12 : memref<1x128xf32, #tpu.memory_space<vmem>>) target_semaphore(%14 : memref<!tpu.dma_semaphore, #tpu.memory_space<semaphore_mem>>)
    %c2_i32 = arith.constant 2 : i32
    %15 = arith.addi %0, %c2_i32 : i32
    %16 = arith.index_cast %15 : i32 to index
    %17 = memref.load %arg1[%16] : memref<32xi32, #tpu.memory_space<smem>>
    %c2_i32_8 = arith.constant 2 : i32
    %c0_i32_9 = arith.constant 0 : i32
    %18 = tpu.memref_slice %arg3[%17, %c0_i32_9] : memref<64x128xf32, #tpu.memory_space<any>> -> memref<1x128xf32, #tpu.memory_space<any>>
    %c2_i32_10 = arith.constant 2 : i32
    %c0_i32_11 = arith.constant 0 : i32
    %19 = tpu.memref_slice %arg5[%c2_i32_10, %c0_i32_11] : memref<8x128xf32, #tpu.memory_space<vmem>> -> memref<1x128xf32, #tpu.memory_space<vmem>>
    %20 = tpu.memref_slice %arg6[%c2_i32_8] : memref<8x!tpu.dma_semaphore, #tpu.memory_space<semaphore_mem>> -> memref<1x!tpu.dma_semaphore, #tpu.memory_space<semaphore_mem>>
    %21 = tpu.memref_squeeze %20 : memref<1x!tpu.dma_semaphore, #tpu.memory_space<semaphore_mem>> -> memref<!tpu.dma_semaphore, #tpu.memory_space<semaphore_mem>>
    tpu.enqueue_dma source(%18 : memref<1x128xf32, #tpu.memory_space<any>>) target(%19 : memref<1x128xf32, #tpu.memory_space<vmem>>) target_semaphore(%21 : memref<!tpu.dma_semaphore, #tpu.memory_space<semaphore_mem>>)
    %c3_i32 = arith.constant 3 : i32
    %22 = arith.addi %0, %c3_i32 : i32
    %23 = arith.index_cast %22 : i32 to index
    %24 = memref.load %arg1[%23] : memref<32xi32, #tpu.memory_space<smem>>
    %c3_i32_12 = arith.constant 3 : i32
    %c0_i32_13 = arith.constant 0 : i32
    %25 = tpu.memref_slice %arg3[%24, %c0_i32_13] : memref<64x128xf32, #tpu.memory_space<any>> -> memref<1x128xf32, #tpu.memory_space<any>>
    %c3_i32_14 = arith.constant 3 : i32
    %c0_i32_15 = arith.constant 0 : i32
    %26 = tpu.memref_slice %arg5[%c3_i32_14, %c0_i32_15] : memref<8x128xf32, #tpu.memory_space<vmem>> -> memref<1x128xf32, #tpu.memory_space<vmem>>
    %27 = tpu.memref_slice %arg6[%c3_i32_12] : memref<8x!tpu.dma_semaphore, #tpu.memory_space<semaphore_mem>> -> memref<1x!tpu.dma_semaphore, #tpu.memory_space<semaphore_mem>>
    %28 = tpu.memref_squeeze %27 : memref<1x!tpu.dma_semaphore, #tpu.memory_space<semaphore_mem>> -> memref<!tpu.dma_semaphore, #tpu.memory_space<semaphore_mem>>
    tpu.enqueue_dma source(%25 : memref<1x128xf32, #tpu.memory_space<any>>) target(%26 : memref<1x128xf32, #tpu.memory_space<vmem>>) target_semaphore(%28 : memref<!tpu.dma_semaphore, #tpu.memory_space<semaphore_mem>>)
    %c4_i32 = arith.constant 4 : i32
    %29 = arith.addi %0, %c4_i32 : i32
    %30 = arith.index_cast %29 : i32 to index
    %31 = memref.load %arg1[%30] : memref<32xi32, #tpu.memory_space<smem>>
    %c4_i32_16 = arith.constant 4 : i32
    %c0_i32_17 = arith.constant 0 : i32
    %32 = tpu.memref_slice %arg3[%31, %c0_i32_17] : memref<64x128xf32, #tpu.memory_space<any>> -> memref<1x128xf32, #tpu.memory_space<any>>
    %c4_i32_18 = arith.constant 4 : i32
    %c0_i32_19 = arith.constant 0 : i32
    %33 = tpu.memref_slice %arg5[%c4_i32_18, %c0_i32_19] : memref<8x128xf32, #tpu.memory_space<vmem>> -> memref<1x128xf32, #tpu.memory_space<vmem>>
    %34 = tpu.memref_slice %arg6[%c4_i32_16] : memref<8x!tpu.dma_semaphore, #tpu.memory_space<semaphore_mem>> -> memref<1x!tpu.dma_semaphore, #tpu.memory_space<semaphore_mem>>
    %35 = tpu.memref_squeeze %34 : memref<1x!tpu.dma_semaphore, #tpu.memory_space<semaphore_mem>> -> memref<!tpu.dma_semaphore, #tpu.memory_space<semaphore_mem>>
    tpu.enqueue_dma source(%32 : memref<1x128xf32, #tpu.memory_space<any>>) target(%33 : memref<1x128xf32, #tpu.memory_space<vmem>>) target_semaphore(%35 : memref<!tpu.dma_semaphore, #tpu.memory_space<semaphore_mem>>)
    %c5_i32 = arith.constant 5 : i32
    %36 = arith.addi %0, %c5_i32 : i32
    %37 = arith.index_cast %36 : i32 to index
    %38 = memref.load %arg1[%37] : memref<32xi32, #tpu.memory_space<smem>>
    %c5_i32_20 = arith.constant 5 : i32
    %c0_i32_21 = arith.constant 0 : i32
    %39 = tpu.memref_slice %arg3[%38, %c0_i32_21] : memref<64x128xf32, #tpu.memory_space<any>> -> memref<1x128xf32, #tpu.memory_space<any>>
    %c5_i32_22 = arith.constant 5 : i32
    %c0_i32_23 = arith.constant 0 : i32
    %40 = tpu.memref_slice %arg5[%c5_i32_22, %c0_i32_23] : memref<8x128xf32, #tpu.memory_space<vmem>> -> memref<1x128xf32, #tpu.memory_space<vmem>>
    %41 = tpu.memref_slice %arg6[%c5_i32_20] : memref<8x!tpu.dma_semaphore, #tpu.memory_space<semaphore_mem>> -> memref<1x!tpu.dma_semaphore, #tpu.memory_space<semaphore_mem>>
    %42 = tpu.memref_squeeze %41 : memref<1x!tpu.dma_semaphore, #tpu.memory_space<semaphore_mem>> -> memref<!tpu.dma_semaphore, #tpu.memory_space<semaphore_mem>>
    tpu.enqueue_dma source(%39 : memref<1x128xf32, #tpu.memory_space<any>>) target(%40 : memref<1x128xf32, #tpu.memory_space<vmem>>) target_semaphore(%42 : memref<!tpu.dma_semaphore, #tpu.memory_space<semaphore_mem>>)
    %c6_i32 = arith.constant 6 : i32
    %43 = arith.addi %0, %c6_i32 : i32
    %44 = arith.index_cast %43 : i32 to index
    %45 = memref.load %arg1[%44] : memref<32xi32, #tpu.memory_space<smem>>
    %c6_i32_24 = arith.constant 6 : i32
    %c0_i32_25 = arith.constant 0 : i32
    %46 = tpu.memref_slice %arg3[%45, %c0_i32_25] : memref<64x128xf32, #tpu.memory_space<any>> -> memref<1x128xf32, #tpu.memory_space<any>>
    %c6_i32_26 = arith.constant 6 : i32
    %c0_i32_27 = arith.constant 0 : i32
    %47 = tpu.memref_slice %arg5[%c6_i32_26, %c0_i32_27] : memref<8x128xf32, #tpu.memory_space<vmem>> -> memref<1x128xf32, #tpu.memory_space<vmem>>
    %48 = tpu.memref_slice %arg6[%c6_i32_24] : memref<8x!tpu.dma_semaphore, #tpu.memory_space<semaphore_mem>> -> memref<1x!tpu.dma_semaphore, #tpu.memory_space<semaphore_mem>>
    %49 = tpu.memref_squeeze %48 : memref<1x!tpu.dma_semaphore, #tpu.memory_space<semaphore_mem>> -> memref<!tpu.dma_semaphore, #tpu.memory_space<semaphore_mem>>
    tpu.enqueue_dma source(%46 : memref<1x128xf32, #tpu.memory_space<any>>) target(%47 : memref<1x128xf32, #tpu.memory_space<vmem>>) target_semaphore(%49 : memref<!tpu.dma_semaphore, #tpu.memory_space<semaphore_mem>>)
    %c7_i32 = arith.constant 7 : i32
    %50 = arith.addi %0, %c7_i32 : i32
    %51 = arith.index_cast %50 : i32 to index
    %52 = memref.load %arg1[%51] : memref<32xi32, #tpu.memory_space<smem>>
    %c7_i32_28 = arith.constant 7 : i32
    %c0_i32_29 = arith.constant 0 : i32
    %53 = tpu.memref_slice %arg3[%52, %c0_i32_29] : memref<64x128xf32, #tpu.memory_space<any>> -> memref<1x128xf32, #tpu.memory_space<any>>
    %c7_i32_30 = arith.constant 7 : i32
    %c0_i32_31 = arith.constant 0 : i32
    %54 = tpu.memref_slice %arg5[%c7_i32_30, %c0_i32_31] : memref<8x128xf32, #tpu.memory_space<vmem>> -> memref<1x128xf32, #tpu.memory_space<vmem>>
    %55 = tpu.memref_slice %arg6[%c7_i32_28] : memref<8x!tpu.dma_semaphore, #tpu.memory_space<semaphore_mem>> -> memref<1x!tpu.dma_semaphore, #tpu.memory_space<semaphore_mem>>
    %56 = tpu.memref_squeeze %55 : memref<1x!tpu.dma_semaphore, #tpu.memory_space<semaphore_mem>> -> memref<!tpu.dma_semaphore, #tpu.memory_space<semaphore_mem>>
    tpu.enqueue_dma source(%53 : memref<1x128xf32, #tpu.memory_space<any>>) target(%54 : memref<1x128xf32, #tpu.memory_space<vmem>>) target_semaphore(%56 : memref<!tpu.dma_semaphore, #tpu.memory_space<semaphore_mem>>)
    %c0_i32_32 = arith.constant 0 : i32
    %c0_i32_33 = arith.constant 0 : i32
    %c0_i32_34 = arith.constant 0 : i32
    %57 = tpu.memref_slice %arg3[%c0_i32_33, %c0_i32_34] : memref<64x128xf32, #tpu.memory_space<any>> -> memref<1x128xf32, #tpu.memory_space<any>>
    %c0_i32_35 = arith.constant 0 : i32
    %c0_i32_36 = arith.constant 0 : i32
    %58 = tpu.memref_slice %arg5[%c0_i32_35, %c0_i32_36] : memref<8x128xf32, #tpu.memory_space<vmem>> -> memref<1x128xf32, #tpu.memory_space<vmem>>
    %59 = tpu.memref_slice %arg6[%c0_i32_32] : memref<8x!tpu.dma_semaphore, #tpu.memory_space<semaphore_mem>> -> memref<1x!tpu.dma_semaphore, #tpu.memory_space<semaphore_mem>>
    %60 = tpu.memref_squeeze %59 : memref<1x!tpu.dma_semaphore, #tpu.memory_space<semaphore_mem>> -> memref<!tpu.dma_semaphore, #tpu.memory_space<semaphore_mem>>
    tpu.wait_dma2 semaphore(%60 : memref<!tpu.dma_semaphore, #tpu.memory_space<semaphore_mem>>) src(%57 : memref<1x128xf32, #tpu.memory_space<any>>) dst(%58 : memref<1x128xf32, #tpu.memory_space<vmem>>)
    %c1_i32_37 = arith.constant 1 : i32
    %c0_i32_38 = arith.constant 0 : i32
    %c0_i32_39 = arith.constant 0 : i32
    %61 = tpu.memref_slice %arg3[%c0_i32_38, %c0_i32_39] : memref<64x128xf32, #tpu.memory_space<any>> -> memref<1x128xf32, #tpu.memory_space<any>>
    %c1_i32_40 = arith.constant 1 : i32
    %c0_i32_41 = arith.constant 0 : i32
    %62 = tpu.memref_slice %arg5[%c1_i32_40, %c0_i32_41] : memref<8x128xf32, #tpu.memory_space<vmem>> -> memref<1x128xf32, #tpu.memory_space<vmem>>
    %63 = tpu.memref_slice %arg6[%c1_i32_37] : memref<8x!tpu.dma_semaphore, #tpu.memory_space<semaphore_mem>> -> memref<1x!tpu.dma_semaphore, #tpu.memory_space<semaphore_mem>>
    %64 = tpu.memref_squeeze %63 : memref<1x!tpu.dma_semaphore, #tpu.memory_space<semaphore_mem>> -> memref<!tpu.dma_semaphore, #tpu.memory_space<semaphore_mem>>
    tpu.wait_dma2 semaphore(%64 : memref<!tpu.dma_semaphore, #tpu.memory_space<semaphore_mem>>) src(%61 : memref<1x128xf32, #tpu.memory_space<any>>) dst(%62 : memref<1x128xf32, #tpu.memory_space<vmem>>)
    %c2_i32_42 = arith.constant 2 : i32
    %c0_i32_43 = arith.constant 0 : i32
    %c0_i32_44 = arith.constant 0 : i32
    %65 = tpu.memref_slice %arg3[%c0_i32_43, %c0_i32_44] : memref<64x128xf32, #tpu.memory_space<any>> -> memref<1x128xf32, #tpu.memory_space<any>>
    %c2_i32_45 = arith.constant 2 : i32
    %c0_i32_46 = arith.constant 0 : i32
    %66 = tpu.memref_slice %arg5[%c2_i32_45, %c0_i32_46] : memref<8x128xf32, #tpu.memory_space<vmem>> -> memref<1x128xf32, #tpu.memory_space<vmem>>
    %67 = tpu.memref_slice %arg6[%c2_i32_42] : memref<8x!tpu.dma_semaphore, #tpu.memory_space<semaphore_mem>> -> memref<1x!tpu.dma_semaphore, #tpu.memory_space<semaphore_mem>>
    %68 = tpu.memref_squeeze %67 : memref<1x!tpu.dma_semaphore, #tpu.memory_space<semaphore_mem>> -> memref<!tpu.dma_semaphore, #tpu.memory_space<semaphore_mem>>
    tpu.wait_dma2 semaphore(%68 : memref<!tpu.dma_semaphore, #tpu.memory_space<semaphore_mem>>) src(%65 : memref<1x128xf32, #tpu.memory_space<any>>) dst(%66 : memref<1x128xf32, #tpu.memory_space<vmem>>)
    %c3_i32_47 = arith.constant 3 : i32
    %c0_i32_48 = arith.constant 0 : i32
    %c0_i32_49 = arith.constant 0 : i32
    %69 = tpu.memref_slice %arg3[%c0_i32_48, %c0_i32_49] : memref<64x128xf32, #tpu.memory_space<any>> -> memref<1x128xf32, #tpu.memory_space<any>>
    %c3_i32_50 = arith.constant 3 : i32
    %c0_i32_51 = arith.constant 0 : i32
    %70 = tpu.memref_slice %arg5[%c3_i32_50, %c0_i32_51] : memref<8x128xf32, #tpu.memory_space<vmem>> -> memref<1x128xf32, #tpu.memory_space<vmem>>
    %71 = tpu.memref_slice %arg6[%c3_i32_47] : memref<8x!tpu.dma_semaphore, #tpu.memory_space<semaphore_mem>> -> memref<1x!tpu.dma_semaphore, #tpu.memory_space<semaphore_mem>>
    %72 = tpu.memref_squeeze %71 : memref<1x!tpu.dma_semaphore, #tpu.memory_space<semaphore_mem>> -> memref<!tpu.dma_semaphore, #tpu.memory_space<semaphore_mem>>
    tpu.wait_dma2 semaphore(%72 : memref<!tpu.dma_semaphore, #tpu.memory_space<semaphore_mem>>) src(%69 : memref<1x128xf32, #tpu.memory_space<any>>) dst(%70 : memref<1x128xf32, #tpu.memory_space<vmem>>)
    %c4_i32_52 = arith.constant 4 : i32
    %c0_i32_53 = arith.constant 0 : i32
    %c0_i32_54 = arith.constant 0 : i32
    %73 = tpu.memref_slice %arg3[%c0_i32_53, %c0_i32_54] : memref<64x128xf32, #tpu.memory_space<any>> -> memref<1x128xf32, #tpu.memory_space<any>>
    %c4_i32_55 = arith.constant 4 : i32
    %c0_i32_56 = arith.constant 0 : i32
    %74 = tpu.memref_slice %arg5[%c4_i32_55, %c0_i32_56] : memref<8x128xf32, #tpu.memory_space<vmem>> -> memref<1x128xf32, #tpu.memory_space<vmem>>
    %75 = tpu.memref_slice %arg6[%c4_i32_52] : memref<8x!tpu.dma_semaphore, #tpu.memory_space<semaphore_mem>> -> memref<1x!tpu.dma_semaphore, #tpu.memory_space<semaphore_mem>>
    %76 = tpu.memref_squeeze %75 : memref<1x!tpu.dma_semaphore, #tpu.memory_space<semaphore_mem>> -> memref<!tpu.dma_semaphore, #tpu.memory_space<semaphore_mem>>
    tpu.wait_dma2 semaphore(%76 : memref<!tpu.dma_semaphore, #tpu.memory_space<semaphore_mem>>) src(%73 : memref<1x128xf32, #tpu.memory_space<any>>) dst(%74 : memref<1x128xf32, #tpu.memory_space<vmem>>)
    %c5_i32_57 = arith.constant 5 : i32
    %c0_i32_58 = arith.constant 0 : i32
    %c0_i32_59 = arith.constant 0 : i32
    %77 = tpu.memref_slice %arg3[%c0_i32_58, %c0_i32_59] : memref<64x128xf32, #tpu.memory_space<any>> -> memref<1x128xf32, #tpu.memory_space<any>>
    %c5_i32_60 = arith.constant 5 : i32
    %c0_i32_61 = arith.constant 0 : i32
    %78 = tpu.memref_slice %arg5[%c5_i32_60, %c0_i32_61] : memref<8x128xf32, #tpu.memory_space<vmem>> -> memref<1x128xf32, #tpu.memory_space<vmem>>
    %79 = tpu.memref_slice %arg6[%c5_i32_57] : memref<8x!tpu.dma_semaphore, #tpu.memory_space<semaphore_mem>> -> memref<1x!tpu.dma_semaphore, #tpu.memory_space<semaphore_mem>>
    %80 = tpu.memref_squeeze %79 : memref<1x!tpu.dma_semaphore, #tpu.memory_space<semaphore_mem>> -> memref<!tpu.dma_semaphore, #tpu.memory_space<semaphore_mem>>
    tpu.wait_dma2 semaphore(%80 : memref<!tpu.dma_semaphore, #tpu.memory_space<semaphore_mem>>) src(%77 : memref<1x128xf32, #tpu.memory_space<any>>) dst(%78 : memref<1x128xf32, #tpu.memory_space<vmem>>)
    %c6_i32_62 = arith.constant 6 : i32
    %c0_i32_63 = arith.constant 0 : i32
    %c0_i32_64 = arith.constant 0 : i32
    %81 = tpu.memref_slice %arg3[%c0_i32_63, %c0_i32_64] : memref<64x128xf32, #tpu.memory_space<any>> -> memref<1x128xf32, #tpu.memory_space<any>>
    %c6_i32_65 = arith.constant 6 : i32
    %c0_i32_66 = arith.constant 0 : i32
    %82 = tpu.memref_slice %arg5[%c6_i32_65, %c0_i32_66] : memref<8x128xf32, #tpu.memory_space<vmem>> -> memref<1x128xf32, #tpu.memory_space<vmem>>
    %83 = tpu.memref_slice %arg6[%c6_i32_62] : memref<8x!tpu.dma_semaphore, #tpu.memory_space<semaphore_mem>> -> memref<1x!tpu.dma_semaphore, #tpu.memory_space<semaphore_mem>>
    %84 = tpu.memref_squeeze %83 : memref<1x!tpu.dma_semaphore, #tpu.memory_space<semaphore_mem>> -> memref<!tpu.dma_semaphore, #tpu.memory_space<semaphore_mem>>
    tpu.wait_dma2 semaphore(%84 : memref<!tpu.dma_semaphore, #tpu.memory_space<semaphore_mem>>) src(%81 : memref<1x128xf32, #tpu.memory_space<any>>) dst(%82 : memref<1x128xf32, #tpu.memory_space<vmem>>)
    %c7_i32_67 = arith.constant 7 : i32
    %c0_i32_68 = arith.constant 0 : i32
    %c0_i32_69 = arith.constant 0 : i32
    %85 = tpu.memref_slice %arg3[%c0_i32_68, %c0_i32_69] : memref<64x128xf32, #tpu.memory_space<any>> -> memref<1x128xf32, #tpu.memory_space<any>>
    %c7_i32_70 = arith.constant 7 : i32
    %c0_i32_71 = arith.constant 0 : i32
    %86 = tpu.memref_slice %arg5[%c7_i32_70, %c0_i32_71] : memref<8x128xf32, #tpu.memory_space<vmem>> -> memref<1x128xf32, #tpu.memory_space<vmem>>
    %87 = tpu.memref_slice %arg6[%c7_i32_67] : memref<8x!tpu.dma_semaphore, #tpu.memory_space<semaphore_mem>> -> memref<1x!tpu.dma_semaphore, #tpu.memory_space<semaphore_mem>>
    %88 = tpu.memref_squeeze %87 : memref<1x!tpu.dma_semaphore, #tpu.memory_space<semaphore_mem>> -> memref<!tpu.dma_semaphore, #tpu.memory_space<semaphore_mem>>
    tpu.wait_dma2 semaphore(%88 : memref<!tpu.dma_semaphore, #tpu.memory_space<semaphore_mem>>) src(%85 : memref<1x128xf32, #tpu.memory_space<any>>) dst(%86 : memref<1x128xf32, #tpu.memory_space<vmem>>)
    %c0 = arith.constant 0 : index
    %c0_72 = arith.constant 0 : index
    %89 = vector.load %arg2[%c0, %c0_72] : memref<8x1xf32, #tpu.memory_space<vmem>>, vector<8x1xf32>
    %c0_73 = arith.constant 0 : index
    %c0_74 = arith.constant 0 : index
    %90 = vector.load %arg5[%c0_73, %c0_74] : memref<8x128xf32, #tpu.memory_space<vmem>>, vector<8x128xf32>
    %91 = vector.broadcast %89 : vector<8x1xf32> to vector<8x128xf32>
    %92 = arith.mulf %91, %90 : vector<8x128xf32>
    %c0_75 = arith.constant 0 : index
    %c0_76 = arith.constant 0 : index
    %93 = vector.load %arg4[%c0_75, %c0_76] : memref<8x128xf32, #tpu.memory_space<vmem>>, vector<8x128xf32>
    tpu.vector_store %arg4[%c0_75, %c0_76], %92 {strides = array<i32>} : memref<8x128xf32, #tpu.memory_space<vmem>>, vector<8x128xf32>,
    return
  }
  func.func @transform_0(%arg0: i32, %arg1: memref<32xi32, #tpu.memory_space<smem>>) -> (i32, i32) {
    %c0_i32 = arith.constant 0 : i32
    %c0_i32_0 = arith.constant 0 : i32
    return %arg0, %c0_i32 : i32, i32
  }
  func.func @transform_2(%arg0: i32, %arg1: memref<32xi32, #tpu.memory_space<smem>>) -> (i32, i32) {
    %c0_i32 = arith.constant 0 : i32
    %c0_i32_0 = arith.constant 0 : i32
    return %arg0, %c0_i32 : i32, i32
  }
}

module attributes {stable_mosaic.version = 11 : i64} {
  func.func @expert_ffn_kernel(%arg0: i32, %arg1: memref<4x16xi32, #tpu.memory_space<smem>>, %arg2: memref<4xi32, #tpu.memory_space<smem>>, %arg3: memref<32x128xf32, #tpu.memory_space<any>>, %arg4: memref<1x128x256xbf16, #tpu.memory_space<vmem>>, %arg5: memref<1x1x256xf32, #tpu.memory_space<vmem>>, %arg6: memref<1x256x128xbf16, #tpu.memory_space<vmem>>, %arg7: memref<1x1x128xf32, #tpu.memory_space<vmem>>, %arg8: memref<1x16x128xf32, #tpu.memory_space<vmem>>, %arg9: memref<16x128xf32, #tpu.memory_space<vmem>>, %arg10: memref<16x!tpu.dma_semaphore, #tpu.memory_space<semaphore_mem>>) attributes {dimension_semantics = [#tpu.dimension_semantics<parallel>], iteration_bounds = array<i64: 4>, scalar_prefetch = 2 : i64, scratch_operands = 2 : i64, tpu.core_type = #tpu.core_type<tc>, window_params = [{}, {transform_indices = @transform_1, window_bounds = array<i64: 1, 128, 256>}, {transform_indices = @transform_2, window_bounds = array<i64: 1, 1, 256>}, {transform_indices = @transform_3, window_bounds = array<i64: 1, 256, 128>}, {transform_indices = @transform_4, window_bounds = array<i64: 1, 1, 128>}, {transform_indices = @transform_5, window_bounds = array<i64: 1, 16, 128>}]} {
    %0 = arith.index_cast %arg0 : i32 to index
    %1 = memref.load %arg2[%0] : memref<4xi32, #tpu.memory_space<smem>>
    %c0_i32 = arith.constant 0 : i32
    %2 = arith.cmpi eq, %1, %c0_i32 : i32
    %3 = arith.extui %2 : i1 to i32
    %c0_i32_0 = arith.constant 0 : i32
    %4 = arith.cmpi ne, %3, %c0_i32_0 : i32
    scf.if %4 {
      %cst = arith.constant 0.000000e+00 : f32
      %8 = vector.broadcast %cst : f32 to vector<16x128xf32>
      %c0 = arith.constant 0 : index
      %c0_3 = arith.constant 0 : index
      %c0_4 = arith.constant 0 : index
      %9 = vector.load %arg8[%c0, %c0_3, %c0_4] : memref<1x16x128xf32, #tpu.memory_space<vmem>>, vector<1x16x128xf32>
      %10 = vector.shape_cast %9 : vector<1x16x128xf32> to vector<16x128xf32>
      %11 = vector.shape_cast %8 : vector<16x128xf32> to vector<1x16x128xf32>
      tpu.vector_store %arg8[%c0, %c0_3, %c0_4], %11 {strides = array<i32>} : memref<1x16x128xf32, #tpu.memory_space<vmem>>, vector<1x16x128xf32>,
    } else {
    }
    %c0_i32_1 = arith.constant 0 : i32
    %5 = arith.cmpi sgt, %1, %c0_i32_1 : i32
    %6 = arith.extui %5 : i1 to i32
    %c0_i32_2 = arith.constant 0 : i32
    %7 = arith.cmpi ne, %6, %c0_i32_2 : i32
    scf.if %7 {
      %8 = arith.index_cast %arg0 : i32 to index
      %c0 = arith.constant 0 : index
      %9 = memref.load %arg1[%8, %c0] : memref<4x16xi32, #tpu.memory_space<smem>>
      %c0_i32_3 = arith.constant 0 : i32
      %c0_i32_4 = arith.constant 0 : i32
      %10 = tpu.memref_slice %arg3[%9, %c0_i32_4] : memref<32x128xf32, #tpu.memory_space<any>> -> memref<1x128xf32, #tpu.memory_space<any>>
      %c0_i32_5 = arith.constant 0 : i32
      %c0_i32_6 = arith.constant 0 : i32
      %11 = tpu.memref_slice %arg9[%c0_i32_5, %c0_i32_6] : memref<16x128xf32, #tpu.memory_space<vmem>> -> memref<1x128xf32, #tpu.memory_space<vmem>>
      %12 = tpu.memref_slice %arg10[%c0_i32_3] : memref<16x!tpu.dma_semaphore, #tpu.memory_space<semaphore_mem>> -> memref<1x!tpu.dma_semaphore, #tpu.memory_space<semaphore_mem>>
      %13 = tpu.memref_squeeze %12 : memref<1x!tpu.dma_semaphore, #tpu.memory_space<semaphore_mem>> -> memref<!tpu.dma_semaphore, #tpu.memory_space<semaphore_mem>>
      tpu.enqueue_dma source(%10 : memref<1x128xf32, #tpu.memory_space<any>>) target(%11 : memref<1x128xf32, #tpu.memory_space<vmem>>) target_semaphore(%13 : memref<!tpu.dma_semaphore, #tpu.memory_space<semaphore_mem>>)
      %14 = arith.index_cast %arg0 : i32 to index
      %c1 = arith.constant 1 : index
      %15 = memref.load %arg1[%14, %c1] : memref<4x16xi32, #tpu.memory_space<smem>>
      %c1_i32 = arith.constant 1 : i32
      %c0_i32_7 = arith.constant 0 : i32
      %16 = tpu.memref_slice %arg3[%15, %c0_i32_7] : memref<32x128xf32, #tpu.memory_space<any>> -> memref<1x128xf32, #tpu.memory_space<any>>
      %c1_i32_8 = arith.constant 1 : i32
      %c0_i32_9 = arith.constant 0 : i32
      %17 = tpu.memref_slice %arg9[%c1_i32_8, %c0_i32_9] : memref<16x128xf32, #tpu.memory_space<vmem>> -> memref<1x128xf32, #tpu.memory_space<vmem>>
      %18 = tpu.memref_slice %arg10[%c1_i32] : memref<16x!tpu.dma_semaphore, #tpu.memory_space<semaphore_mem>> -> memref<1x!tpu.dma_semaphore, #tpu.memory_space<semaphore_mem>>
      %19 = tpu.memref_squeeze %18 : memref<1x!tpu.dma_semaphore, #tpu.memory_space<semaphore_mem>> -> memref<!tpu.dma_semaphore, #tpu.memory_space<semaphore_mem>>
      tpu.enqueue_dma source(%16 : memref<1x128xf32, #tpu.memory_space<any>>) target(%17 : memref<1x128xf32, #tpu.memory_space<vmem>>) target_semaphore(%19 : memref<!tpu.dma_semaphore, #tpu.memory_space<semaphore_mem>>)
      %20 = arith.index_cast %arg0 : i32 to index
      %c2 = arith.constant 2 : index
      %21 = memref.load %arg1[%20, %c2] : memref<4x16xi32, #tpu.memory_space<smem>>
      %c2_i32 = arith.constant 2 : i32
      %c0_i32_10 = arith.constant 0 : i32
      %22 = tpu.memref_slice %arg3[%21, %c0_i32_10] : memref<32x128xf32, #tpu.memory_space<any>> -> memref<1x128xf32, #tpu.memory_space<any>>
      %c2_i32_11 = arith.constant 2 : i32
      %c0_i32_12 = arith.constant 0 : i32
      %23 = tpu.memref_slice %arg9[%c2_i32_11, %c0_i32_12] : memref<16x128xf32, #tpu.memory_space<vmem>> -> memref<1x128xf32, #tpu.memory_space<vmem>>
      %24 = tpu.memref_slice %arg10[%c2_i32] : memref<16x!tpu.dma_semaphore, #tpu.memory_space<semaphore_mem>> -> memref<1x!tpu.dma_semaphore, #tpu.memory_space<semaphore_mem>>
      %25 = tpu.memref_squeeze %24 : memref<1x!tpu.dma_semaphore, #tpu.memory_space<semaphore_mem>> -> memref<!tpu.dma_semaphore, #tpu.memory_space<semaphore_mem>>
      tpu.enqueue_dma source(%22 : memref<1x128xf32, #tpu.memory_space<any>>) target(%23 : memref<1x128xf32, #tpu.memory_space<vmem>>) target_semaphore(%25 : memref<!tpu.dma_semaphore, #tpu.memory_space<semaphore_mem>>)
      %26 = arith.index_cast %arg0 : i32 to index
      %c3 = arith.constant 3 : index
      %27 = memref.load %arg1[%26, %c3] : memref<4x16xi32, #tpu.memory_space<smem>>
      %c3_i32 = arith.constant 3 : i32
      %c0_i32_13 = arith.constant 0 : i32
      %28 = tpu.memref_slice %arg3[%27, %c0_i32_13] : memref<32x128xf32, #tpu.memory_space<any>> -> memref<1x128xf32, #tpu.memory_space<any>>
      %c3_i32_14 = arith.constant 3 : i32
      %c0_i32_15 = arith.constant 0 : i32
      %29 = tpu.memref_slice %arg9[%c3_i32_14, %c0_i32_15] : memref<16x128xf32, #tpu.memory_space<vmem>> -> memref<1x128xf32, #tpu.memory_space<vmem>>
      %30 = tpu.memref_slice %arg10[%c3_i32] : memref<16x!tpu.dma_semaphore, #tpu.memory_space<semaphore_mem>> -> memref<1x!tpu.dma_semaphore, #tpu.memory_space<semaphore_mem>>
      %31 = tpu.memref_squeeze %30 : memref<1x!tpu.dma_semaphore, #tpu.memory_space<semaphore_mem>> -> memref<!tpu.dma_semaphore, #tpu.memory_space<semaphore_mem>>
      tpu.enqueue_dma source(%28 : memref<1x128xf32, #tpu.memory_space<any>>) target(%29 : memref<1x128xf32, #tpu.memory_space<vmem>>) target_semaphore(%31 : memref<!tpu.dma_semaphore, #tpu.memory_space<semaphore_mem>>)
      %32 = arith.index_cast %arg0 : i32 to index
      %c4 = arith.constant 4 : index
      %33 = memref.load %arg1[%32, %c4] : memref<4x16xi32, #tpu.memory_space<smem>>
      %c4_i32 = arith.constant 4 : i32
      %c0_i32_16 = arith.constant 0 : i32
      %34 = tpu.memref_slice %arg3[%33, %c0_i32_16] : memref<32x128xf32, #tpu.memory_space<any>> -> memref<1x128xf32, #tpu.memory_space<any>>
      %c4_i32_17 = arith.constant 4 : i32
      %c0_i32_18 = arith.constant 0 : i32
      %35 = tpu.memref_slice %arg9[%c4_i32_17, %c0_i32_18] : memref<16x128xf32, #tpu.memory_space<vmem>> -> memref<1x128xf32, #tpu.memory_space<vmem>>
      %36 = tpu.memref_slice %arg10[%c4_i32] : memref<16x!tpu.dma_semaphore, #tpu.memory_space<semaphore_mem>> -> memref<1x!tpu.dma_semaphore, #tpu.memory_space<semaphore_mem>>
      %37 = tpu.memref_squeeze %36 : memref<1x!tpu.dma_semaphore, #tpu.memory_space<semaphore_mem>> -> memref<!tpu.dma_semaphore, #tpu.memory_space<semaphore_mem>>
      tpu.enqueue_dma source(%34 : memref<1x128xf32, #tpu.memory_space<any>>) target(%35 : memref<1x128xf32, #tpu.memory_space<vmem>>) target_semaphore(%37 : memref<!tpu.dma_semaphore, #tpu.memory_space<semaphore_mem>>)
      %38 = arith.index_cast %arg0 : i32 to index
      %c5 = arith.constant 5 : index
      %39 = memref.load %arg1[%38, %c5] : memref<4x16xi32, #tpu.memory_space<smem>>
      %c5_i32 = arith.constant 5 : i32
      %c0_i32_19 = arith.constant 0 : i32
      %40 = tpu.memref_slice %arg3[%39, %c0_i32_19] : memref<32x128xf32, #tpu.memory_space<any>> -> memref<1x128xf32, #tpu.memory_space<any>>
      %c5_i32_20 = arith.constant 5 : i32
      %c0_i32_21 = arith.constant 0 : i32
      %41 = tpu.memref_slice %arg9[%c5_i32_20, %c0_i32_21] : memref<16x128xf32, #tpu.memory_space<vmem>> -> memref<1x128xf32, #tpu.memory_space<vmem>>
      %42 = tpu.memref_slice %arg10[%c5_i32] : memref<16x!tpu.dma_semaphore, #tpu.memory_space<semaphore_mem>> -> memref<1x!tpu.dma_semaphore, #tpu.memory_space<semaphore_mem>>
      %43 = tpu.memref_squeeze %42 : memref<1x!tpu.dma_semaphore, #tpu.memory_space<semaphore_mem>> -> memref<!tpu.dma_semaphore, #tpu.memory_space<semaphore_mem>>
      tpu.enqueue_dma source(%40 : memref<1x128xf32, #tpu.memory_space<any>>) target(%41 : memref<1x128xf32, #tpu.memory_space<vmem>>) target_semaphore(%43 : memref<!tpu.dma_semaphore, #tpu.memory_space<semaphore_mem>>)
      %44 = arith.index_cast %arg0 : i32 to index
      %c6 = arith.constant 6 : index
      %45 = memref.load %arg1[%44, %c6] : memref<4x16xi32, #tpu.memory_space<smem>>
      %c6_i32 = arith.constant 6 : i32
      %c0_i32_22 = arith.constant 0 : i32
      %46 = tpu.memref_slice %arg3[%45, %c0_i32_22] : memref<32x128xf32, #tpu.memory_space<any>> -> memref<1x128xf32, #tpu.memory_space<any>>
      %c6_i32_23 = arith.constant 6 : i32
      %c0_i32_24 = arith.constant 0 : i32
      %47 = tpu.memref_slice %arg9[%c6_i32_23, %c0_i32_24] : memref<16x128xf32, #tpu.memory_space<vmem>> -> memref<1x128xf32, #tpu.memory_space<vmem>>
      %48 = tpu.memref_slice %arg10[%c6_i32] : memref<16x!tpu.dma_semaphore, #tpu.memory_space<semaphore_mem>> -> memref<1x!tpu.dma_semaphore, #tpu.memory_space<semaphore_mem>>
      %49 = tpu.memref_squeeze %48 : memref<1x!tpu.dma_semaphore, #tpu.memory_space<semaphore_mem>> -> memref<!tpu.dma_semaphore, #tpu.memory_space<semaphore_mem>>
      tpu.enqueue_dma source(%46 : memref<1x128xf32, #tpu.memory_space<any>>) target(%47 : memref<1x128xf32, #tpu.memory_space<vmem>>) target_semaphore(%49 : memref<!tpu.dma_semaphore, #tpu.memory_space<semaphore_mem>>)
      %50 = arith.index_cast %arg0 : i32 to index
      %c7 = arith.constant 7 : index
      %51 = memref.load %arg1[%50, %c7] : memref<4x16xi32, #tpu.memory_space<smem>>
      %c7_i32 = arith.constant 7 : i32
      %c0_i32_25 = arith.constant 0 : i32
      %52 = tpu.memref_slice %arg3[%51, %c0_i32_25] : memref<32x128xf32, #tpu.memory_space<any>> -> memref<1x128xf32, #tpu.memory_space<any>>
      %c7_i32_26 = arith.constant 7 : i32
      %c0_i32_27 = arith.constant 0 : i32
      %53 = tpu.memref_slice %arg9[%c7_i32_26, %c0_i32_27] : memref<16x128xf32, #tpu.memory_space<vmem>> -> memref<1x128xf32, #tpu.memory_space<vmem>>
      %54 = tpu.memref_slice %arg10[%c7_i32] : memref<16x!tpu.dma_semaphore, #tpu.memory_space<semaphore_mem>> -> memref<1x!tpu.dma_semaphore, #tpu.memory_space<semaphore_mem>>
      %55 = tpu.memref_squeeze %54 : memref<1x!tpu.dma_semaphore, #tpu.memory_space<semaphore_mem>> -> memref<!tpu.dma_semaphore, #tpu.memory_space<semaphore_mem>>
      tpu.enqueue_dma source(%52 : memref<1x128xf32, #tpu.memory_space<any>>) target(%53 : memref<1x128xf32, #tpu.memory_space<vmem>>) target_semaphore(%55 : memref<!tpu.dma_semaphore, #tpu.memory_space<semaphore_mem>>)
      %56 = arith.index_cast %arg0 : i32 to index
      %c8 = arith.constant 8 : index
      %57 = memref.load %arg1[%56, %c8] : memref<4x16xi32, #tpu.memory_space<smem>>
      %c8_i32 = arith.constant 8 : i32
      %c0_i32_28 = arith.constant 0 : i32
      %58 = tpu.memref_slice %arg3[%57, %c0_i32_28] : memref<32x128xf32, #tpu.memory_space<any>> -> memref<1x128xf32, #tpu.memory_space<any>>
      %c8_i32_29 = arith.constant 8 : i32
      %c0_i32_30 = arith.constant 0 : i32
      %59 = tpu.memref_slice %arg9[%c8_i32_29, %c0_i32_30] : memref<16x128xf32, #tpu.memory_space<vmem>> -> memref<1x128xf32, #tpu.memory_space<vmem>>
      %60 = tpu.memref_slice %arg10[%c8_i32] : memref<16x!tpu.dma_semaphore, #tpu.memory_space<semaphore_mem>> -> memref<1x!tpu.dma_semaphore, #tpu.memory_space<semaphore_mem>>
      %61 = tpu.memref_squeeze %60 : memref<1x!tpu.dma_semaphore, #tpu.memory_space<semaphore_mem>> -> memref<!tpu.dma_semaphore, #tpu.memory_space<semaphore_mem>>
      tpu.enqueue_dma source(%58 : memref<1x128xf32, #tpu.memory_space<any>>) target(%59 : memref<1x128xf32, #tpu.memory_space<vmem>>) target_semaphore(%61 : memref<!tpu.dma_semaphore, #tpu.memory_space<semaphore_mem>>)
      %62 = arith.index_cast %arg0 : i32 to index
      %c9 = arith.constant 9 : index
      %63 = memref.load %arg1[%62, %c9] : memref<4x16xi32, #tpu.memory_space<smem>>
      %c9_i32 = arith.constant 9 : i32
      %c0_i32_31 = arith.constant 0 : i32
      %64 = tpu.memref_slice %arg3[%63, %c0_i32_31] : memref<32x128xf32, #tpu.memory_space<any>> -> memref<1x128xf32, #tpu.memory_space<any>>
      %c9_i32_32 = arith.constant 9 : i32
      %c0_i32_33 = arith.constant 0 : i32
      %65 = tpu.memref_slice %arg9[%c9_i32_32, %c0_i32_33] : memref<16x128xf32, #tpu.memory_space<vmem>> -> memref<1x128xf32, #tpu.memory_space<vmem>>
      %66 = tpu.memref_slice %arg10[%c9_i32] : memref<16x!tpu.dma_semaphore, #tpu.memory_space<semaphore_mem>> -> memref<1x!tpu.dma_semaphore, #tpu.memory_space<semaphore_mem>>
      %67 = tpu.memref_squeeze %66 : memref<1x!tpu.dma_semaphore, #tpu.memory_space<semaphore_mem>> -> memref<!tpu.dma_semaphore, #tpu.memory_space<semaphore_mem>>
      tpu.enqueue_dma source(%64 : memref<1x128xf32, #tpu.memory_space<any>>) target(%65 : memref<1x128xf32, #tpu.memory_space<vmem>>) target_semaphore(%67 : memref<!tpu.dma_semaphore, #tpu.memory_space<semaphore_mem>>)
      %68 = arith.index_cast %arg0 : i32 to index
      %c10 = arith.constant 10 : index
      %69 = memref.load %arg1[%68, %c10] : memref<4x16xi32, #tpu.memory_space<smem>>
      %c10_i32 = arith.constant 10 : i32
      %c0_i32_34 = arith.constant 0 : i32
      %70 = tpu.memref_slice %arg3[%69, %c0_i32_34] : memref<32x128xf32, #tpu.memory_space<any>> -> memref<1x128xf32, #tpu.memory_space<any>>
      %c10_i32_35 = arith.constant 10 : i32
      %c0_i32_36 = arith.constant 0 : i32
      %71 = tpu.memref_slice %arg9[%c10_i32_35, %c0_i32_36] : memref<16x128xf32, #tpu.memory_space<vmem>> -> memref<1x128xf32, #tpu.memory_space<vmem>>
      %72 = tpu.memref_slice %arg10[%c10_i32] : memref<16x!tpu.dma_semaphore, #tpu.memory_space<semaphore_mem>> -> memref<1x!tpu.dma_semaphore, #tpu.memory_space<semaphore_mem>>
      %73 = tpu.memref_squeeze %72 : memref<1x!tpu.dma_semaphore, #tpu.memory_space<semaphore_mem>> -> memref<!tpu.dma_semaphore, #tpu.memory_space<semaphore_mem>>
      tpu.enqueue_dma source(%70 : memref<1x128xf32, #tpu.memory_space<any>>) target(%71 : memref<1x128xf32, #tpu.memory_space<vmem>>) target_semaphore(%73 : memref<!tpu.dma_semaphore, #tpu.memory_space<semaphore_mem>>)
      %74 = arith.index_cast %arg0 : i32 to index
      %c11 = arith.constant 11 : index
      %75 = memref.load %arg1[%74, %c11] : memref<4x16xi32, #tpu.memory_space<smem>>
      %c11_i32 = arith.constant 11 : i32
      %c0_i32_37 = arith.constant 0 : i32
      %76 = tpu.memref_slice %arg3[%75, %c0_i32_37] : memref<32x128xf32, #tpu.memory_space<any>> -> memref<1x128xf32, #tpu.memory_space<any>>
      %c11_i32_38 = arith.constant 11 : i32
      %c0_i32_39 = arith.constant 0 : i32
      %77 = tpu.memref_slice %arg9[%c11_i32_38, %c0_i32_39] : memref<16x128xf32, #tpu.memory_space<vmem>> -> memref<1x128xf32, #tpu.memory_space<vmem>>
      %78 = tpu.memref_slice %arg10[%c11_i32] : memref<16x!tpu.dma_semaphore, #tpu.memory_space<semaphore_mem>> -> memref<1x!tpu.dma_semaphore, #tpu.memory_space<semaphore_mem>>
      %79 = tpu.memref_squeeze %78 : memref<1x!tpu.dma_semaphore, #tpu.memory_space<semaphore_mem>> -> memref<!tpu.dma_semaphore, #tpu.memory_space<semaphore_mem>>
      tpu.enqueue_dma source(%76 : memref<1x128xf32, #tpu.memory_space<any>>) target(%77 : memref<1x128xf32, #tpu.memory_space<vmem>>) target_semaphore(%79 : memref<!tpu.dma_semaphore, #tpu.memory_space<semaphore_mem>>)
      %80 = arith.index_cast %arg0 : i32 to index
      %c12 = arith.constant 12 : index
      %81 = memref.load %arg1[%80, %c12] : memref<4x16xi32, #tpu.memory_space<smem>>
      %c12_i32 = arith.constant 12 : i32
      %c0_i32_40 = arith.constant 0 : i32
      %82 = tpu.memref_slice %arg3[%81, %c0_i32_40] : memref<32x128xf32, #tpu.memory_space<any>> -> memref<1x128xf32, #tpu.memory_space<any>>
      %c12_i32_41 = arith.constant 12 : i32
      %c0_i32_42 = arith.constant 0 : i32
      %83 = tpu.memref_slice %arg9[%c12_i32_41, %c0_i32_42] : memref<16x128xf32, #tpu.memory_space<vmem>> -> memref<1x128xf32, #tpu.memory_space<vmem>>
      %84 = tpu.memref_slice %arg10[%c12_i32] : memref<16x!tpu.dma_semaphore, #tpu.memory_space<semaphore_mem>> -> memref<1x!tpu.dma_semaphore, #tpu.memory_space<semaphore_mem>>
      %85 = tpu.memref_squeeze %84 : memref<1x!tpu.dma_semaphore, #tpu.memory_space<semaphore_mem>> -> memref<!tpu.dma_semaphore, #tpu.memory_space<semaphore_mem>>
      tpu.enqueue_dma source(%82 : memref<1x128xf32, #tpu.memory_space<any>>) target(%83 : memref<1x128xf32, #tpu.memory_space<vmem>>) target_semaphore(%85 : memref<!tpu.dma_semaphore, #tpu.memory_space<semaphore_mem>>)
      %86 = arith.index_cast %arg0 : i32 to index
      %c13 = arith.constant 13 : index
      %87 = memref.load %arg1[%86, %c13] : memref<4x16xi32, #tpu.memory_space<smem>>
      %c13_i32 = arith.constant 13 : i32
      %c0_i32_43 = arith.constant 0 : i32
      %88 = tpu.memref_slice %arg3[%87, %c0_i32_43] : memref<32x128xf32, #tpu.memory_space<any>> -> memref<1x128xf32, #tpu.memory_space<any>>
      %c13_i32_44 = arith.constant 13 : i32
      %c0_i32_45 = arith.constant 0 : i32
      %89 = tpu.memref_slice %arg9[%c13_i32_44, %c0_i32_45] : memref<16x128xf32, #tpu.memory_space<vmem>> -> memref<1x128xf32, #tpu.memory_space<vmem>>
      %90 = tpu.memref_slice %arg10[%c13_i32] : memref<16x!tpu.dma_semaphore, #tpu.memory_space<semaphore_mem>> -> memref<1x!tpu.dma_semaphore, #tpu.memory_space<semaphore_mem>>
      %91 = tpu.memref_squeeze %90 : memref<1x!tpu.dma_semaphore, #tpu.memory_space<semaphore_mem>> -> memref<!tpu.dma_semaphore, #tpu.memory_space<semaphore_mem>>
      tpu.enqueue_dma source(%88 : memref<1x128xf32, #tpu.memory_space<any>>) target(%89 : memref<1x128xf32, #tpu.memory_space<vmem>>) target_semaphore(%91 : memref<!tpu.dma_semaphore, #tpu.memory_space<semaphore_mem>>)
      %92 = arith.index_cast %arg0 : i32 to index
      %c14 = arith.constant 14 : index
      %93 = memref.load %arg1[%92, %c14] : memref<4x16xi32, #tpu.memory_space<smem>>
      %c14_i32 = arith.constant 14 : i32
      %c0_i32_46 = arith.constant 0 : i32
      %94 = tpu.memref_slice %arg3[%93, %c0_i32_46] : memref<32x128xf32, #tpu.memory_space<any>> -> memref<1x128xf32, #tpu.memory_space<any>>
      %c14_i32_47 = arith.constant 14 : i32
      %c0_i32_48 = arith.constant 0 : i32
      %95 = tpu.memref_slice %arg9[%c14_i32_47, %c0_i32_48] : memref<16x128xf32, #tpu.memory_space<vmem>> -> memref<1x128xf32, #tpu.memory_space<vmem>>
      %96 = tpu.memref_slice %arg10[%c14_i32] : memref<16x!tpu.dma_semaphore, #tpu.memory_space<semaphore_mem>> -> memref<1x!tpu.dma_semaphore, #tpu.memory_space<semaphore_mem>>
      %97 = tpu.memref_squeeze %96 : memref<1x!tpu.dma_semaphore, #tpu.memory_space<semaphore_mem>> -> memref<!tpu.dma_semaphore, #tpu.memory_space<semaphore_mem>>
      tpu.enqueue_dma source(%94 : memref<1x128xf32, #tpu.memory_space<any>>) target(%95 : memref<1x128xf32, #tpu.memory_space<vmem>>) target_semaphore(%97 : memref<!tpu.dma_semaphore, #tpu.memory_space<semaphore_mem>>)
      %98 = arith.index_cast %arg0 : i32 to index
      %c15 = arith.constant 15 : index
      %99 = memref.load %arg1[%98, %c15] : memref<4x16xi32, #tpu.memory_space<smem>>
      %c15_i32 = arith.constant 15 : i32
      %c0_i32_49 = arith.constant 0 : i32
      %100 = tpu.memref_slice %arg3[%99, %c0_i32_49] : memref<32x128xf32, #tpu.memory_space<any>> -> memref<1x128xf32, #tpu.memory_space<any>>
      %c15_i32_50 = arith.constant 15 : i32
      %c0_i32_51 = arith.constant 0 : i32
      %101 = tpu.memref_slice %arg9[%c15_i32_50, %c0_i32_51] : memref<16x128xf32, #tpu.memory_space<vmem>> -> memref<1x128xf32, #tpu.memory_space<vmem>>
      %102 = tpu.memref_slice %arg10[%c15_i32] : memref<16x!tpu.dma_semaphore, #tpu.memory_space<semaphore_mem>> -> memref<1x!tpu.dma_semaphore, #tpu.memory_space<semaphore_mem>>
      %103 = tpu.memref_squeeze %102 : memref<1x!tpu.dma_semaphore, #tpu.memory_space<semaphore_mem>> -> memref<!tpu.dma_semaphore, #tpu.memory_space<semaphore_mem>>
      tpu.enqueue_dma source(%100 : memref<1x128xf32, #tpu.memory_space<any>>) target(%101 : memref<1x128xf32, #tpu.memory_space<vmem>>) target_semaphore(%103 : memref<!tpu.dma_semaphore, #tpu.memory_space<semaphore_mem>>)
      %c0_i32_52 = arith.constant 0 : i32
      %c0_i32_53 = arith.constant 0 : i32
      %c0_i32_54 = arith.constant 0 : i32
      %104 = tpu.memref_slice %arg3[%c0_i32_53, %c0_i32_54] : memref<32x128xf32, #tpu.memory_space<any>> -> memref<1x128xf32, #tpu.memory_space<any>>
      %c0_i32_55 = arith.constant 0 : i32
      %c0_i32_56 = arith.constant 0 : i32
      %105 = tpu.memref_slice %arg9[%c0_i32_55, %c0_i32_56] : memref<16x128xf32, #tpu.memory_space<vmem>> -> memref<1x128xf32, #tpu.memory_space<vmem>>
      %106 = tpu.memref_slice %arg10[%c0_i32_52] : memref<16x!tpu.dma_semaphore, #tpu.memory_space<semaphore_mem>> -> memref<1x!tpu.dma_semaphore, #tpu.memory_space<semaphore_mem>>
      %107 = tpu.memref_squeeze %106 : memref<1x!tpu.dma_semaphore, #tpu.memory_space<semaphore_mem>> -> memref<!tpu.dma_semaphore, #tpu.memory_space<semaphore_mem>>
      tpu.wait_dma2 semaphore(%107 : memref<!tpu.dma_semaphore, #tpu.memory_space<semaphore_mem>>) src(%104 : memref<1x128xf32, #tpu.memory_space<any>>) dst(%105 : memref<1x128xf32, #tpu.memory_space<vmem>>)
      %c1_i32_57 = arith.constant 1 : i32
      %c0_i32_58 = arith.constant 0 : i32
      %c0_i32_59 = arith.constant 0 : i32
      %108 = tpu.memref_slice %arg3[%c0_i32_58, %c0_i32_59] : memref<32x128xf32, #tpu.memory_space<any>> -> memref<1x128xf32, #tpu.memory_space<any>>
      %c1_i32_60 = arith.constant 1 : i32
      %c0_i32_61 = arith.constant 0 : i32
      %109 = tpu.memref_slice %arg9[%c1_i32_60, %c0_i32_61] : memref<16x128xf32, #tpu.memory_space<vmem>> -> memref<1x128xf32, #tpu.memory_space<vmem>>
      %110 = tpu.memref_slice %arg10[%c1_i32_57] : memref<16x!tpu.dma_semaphore, #tpu.memory_space<semaphore_mem>> -> memref<1x!tpu.dma_semaphore, #tpu.memory_space<semaphore_mem>>
      %111 = tpu.memref_squeeze %110 : memref<1x!tpu.dma_semaphore, #tpu.memory_space<semaphore_mem>> -> memref<!tpu.dma_semaphore, #tpu.memory_space<semaphore_mem>>
      tpu.wait_dma2 semaphore(%111 : memref<!tpu.dma_semaphore, #tpu.memory_space<semaphore_mem>>) src(%108 : memref<1x128xf32, #tpu.memory_space<any>>) dst(%109 : memref<1x128xf32, #tpu.memory_space<vmem>>)
      %c2_i32_62 = arith.constant 2 : i32
      %c0_i32_63 = arith.constant 0 : i32
      %c0_i32_64 = arith.constant 0 : i32
      %112 = tpu.memref_slice %arg3[%c0_i32_63, %c0_i32_64] : memref<32x128xf32, #tpu.memory_space<any>> -> memref<1x128xf32, #tpu.memory_space<any>>
      %c2_i32_65 = arith.constant 2 : i32
      %c0_i32_66 = arith.constant 0 : i32
      %113 = tpu.memref_slice %arg9[%c2_i32_65, %c0_i32_66] : memref<16x128xf32, #tpu.memory_space<vmem>> -> memref<1x128xf32, #tpu.memory_space<vmem>>
      %114 = tpu.memref_slice %arg10[%c2_i32_62] : memref<16x!tpu.dma_semaphore, #tpu.memory_space<semaphore_mem>> -> memref<1x!tpu.dma_semaphore, #tpu.memory_space<semaphore_mem>>
      %115 = tpu.memref_squeeze %114 : memref<1x!tpu.dma_semaphore, #tpu.memory_space<semaphore_mem>> -> memref<!tpu.dma_semaphore, #tpu.memory_space<semaphore_mem>>
      tpu.wait_dma2 semaphore(%115 : memref<!tpu.dma_semaphore, #tpu.memory_space<semaphore_mem>>) src(%112 : memref<1x128xf32, #tpu.memory_space<any>>) dst(%113 : memref<1x128xf32, #tpu.memory_space<vmem>>)
      %c3_i32_67 = arith.constant 3 : i32
      %c0_i32_68 = arith.constant 0 : i32
      %c0_i32_69 = arith.constant 0 : i32
      %116 = tpu.memref_slice %arg3[%c0_i32_68, %c0_i32_69] : memref<32x128xf32, #tpu.memory_space<any>> -> memref<1x128xf32, #tpu.memory_space<any>>
      %c3_i32_70 = arith.constant 3 : i32
      %c0_i32_71 = arith.constant 0 : i32
      %117 = tpu.memref_slice %arg9[%c3_i32_70, %c0_i32_71] : memref<16x128xf32, #tpu.memory_space<vmem>> -> memref<1x128xf32, #tpu.memory_space<vmem>>
      %118 = tpu.memref_slice %arg10[%c3_i32_67] : memref<16x!tpu.dma_semaphore, #tpu.memory_space<semaphore_mem>> -> memref<1x!tpu.dma_semaphore, #tpu.memory_space<semaphore_mem>>
      %119 = tpu.memref_squeeze %118 : memref<1x!tpu.dma_semaphore, #tpu.memory_space<semaphore_mem>> -> memref<!tpu.dma_semaphore, #tpu.memory_space<semaphore_mem>>
      tpu.wait_dma2 semaphore(%119 : memref<!tpu.dma_semaphore, #tpu.memory_space<semaphore_mem>>) src(%116 : memref<1x128xf32, #tpu.memory_space<any>>) dst(%117 : memref<1x128xf32, #tpu.memory_space<vmem>>)
      %c4_i32_72 = arith.constant 4 : i32
      %c0_i32_73 = arith.constant 0 : i32
      %c0_i32_74 = arith.constant 0 : i32
      %120 = tpu.memref_slice %arg3[%c0_i32_73, %c0_i32_74] : memref<32x128xf32, #tpu.memory_space<any>> -> memref<1x128xf32, #tpu.memory_space<any>>
      %c4_i32_75 = arith.constant 4 : i32
      %c0_i32_76 = arith.constant 0 : i32
      %121 = tpu.memref_slice %arg9[%c4_i32_75, %c0_i32_76] : memref<16x128xf32, #tpu.memory_space<vmem>> -> memref<1x128xf32, #tpu.memory_space<vmem>>
      %122 = tpu.memref_slice %arg10[%c4_i32_72] : memref<16x!tpu.dma_semaphore, #tpu.memory_space<semaphore_mem>> -> memref<1x!tpu.dma_semaphore, #tpu.memory_space<semaphore_mem>>
      %123 = tpu.memref_squeeze %122 : memref<1x!tpu.dma_semaphore, #tpu.memory_space<semaphore_mem>> -> memref<!tpu.dma_semaphore, #tpu.memory_space<semaphore_mem>>
      tpu.wait_dma2 semaphore(%123 : memref<!tpu.dma_semaphore, #tpu.memory_space<semaphore_mem>>) src(%120 : memref<1x128xf32, #tpu.memory_space<any>>) dst(%121 : memref<1x128xf32, #tpu.memory_space<vmem>>)
      %c5_i32_77 = arith.constant 5 : i32
      %c0_i32_78 = arith.constant 0 : i32
      %c0_i32_79 = arith.constant 0 : i32
      %124 = tpu.memref_slice %arg3[%c0_i32_78, %c0_i32_79] : memref<32x128xf32, #tpu.memory_space<any>> -> memref<1x128xf32, #tpu.memory_space<any>>
      %c5_i32_80 = arith.constant 5 : i32
      %c0_i32_81 = arith.constant 0 : i32
      %125 = tpu.memref_slice %arg9[%c5_i32_80, %c0_i32_81] : memref<16x128xf32, #tpu.memory_space<vmem>> -> memref<1x128xf32, #tpu.memory_space<vmem>>
      %126 = tpu.memref_slice %arg10[%c5_i32_77] : memref<16x!tpu.dma_semaphore, #tpu.memory_space<semaphore_mem>> -> memref<1x!tpu.dma_semaphore, #tpu.memory_space<semaphore_mem>>
      %127 = tpu.memref_squeeze %126 : memref<1x!tpu.dma_semaphore, #tpu.memory_space<semaphore_mem>> -> memref<!tpu.dma_semaphore, #tpu.memory_space<semaphore_mem>>
      tpu.wait_dma2 semaphore(%127 : memref<!tpu.dma_semaphore, #tpu.memory_space<semaphore_mem>>) src(%124 : memref<1x128xf32, #tpu.memory_space<any>>) dst(%125 : memref<1x128xf32, #tpu.memory_space<vmem>>)
      %c6_i32_82 = arith.constant 6 : i32
      %c0_i32_83 = arith.constant 0 : i32
      %c0_i32_84 = arith.constant 0 : i32
      %128 = tpu.memref_slice %arg3[%c0_i32_83, %c0_i32_84] : memref<32x128xf32, #tpu.memory_space<any>> -> memref<1x128xf32, #tpu.memory_space<any>>
      %c6_i32_85 = arith.constant 6 : i32
      %c0_i32_86 = arith.constant 0 : i32
      %129 = tpu.memref_slice %arg9[%c6_i32_85, %c0_i32_86] : memref<16x128xf32, #tpu.memory_space<vmem>> -> memref<1x128xf32, #tpu.memory_space<vmem>>
      %130 = tpu.memref_slice %arg10[%c6_i32_82] : memref<16x!tpu.dma_semaphore, #tpu.memory_space<semaphore_mem>> -> memref<1x!tpu.dma_semaphore, #tpu.memory_space<semaphore_mem>>
      %131 = tpu.memref_squeeze %130 : memref<1x!tpu.dma_semaphore, #tpu.memory_space<semaphore_mem>> -> memref<!tpu.dma_semaphore, #tpu.memory_space<semaphore_mem>>
      tpu.wait_dma2 semaphore(%131 : memref<!tpu.dma_semaphore, #tpu.memory_space<semaphore_mem>>) src(%128 : memref<1x128xf32, #tpu.memory_space<any>>) dst(%129 : memref<1x128xf32, #tpu.memory_space<vmem>>)
      %c7_i32_87 = arith.constant 7 : i32
      %c0_i32_88 = arith.constant 0 : i32
      %c0_i32_89 = arith.constant 0 : i32
      %132 = tpu.memref_slice %arg3[%c0_i32_88, %c0_i32_89] : memref<32x128xf32, #tpu.memory_space<any>> -> memref<1x128xf32, #tpu.memory_space<any>>
      %c7_i32_90 = arith.constant 7 : i32
      %c0_i32_91 = arith.constant 0 : i32
      %133 = tpu.memref_slice %arg9[%c7_i32_90, %c0_i32_91] : memref<16x128xf32, #tpu.memory_space<vmem>> -> memref<1x128xf32, #tpu.memory_space<vmem>>
      %134 = tpu.memref_slice %arg10[%c7_i32_87] : memref<16x!tpu.dma_semaphore, #tpu.memory_space<semaphore_mem>> -> memref<1x!tpu.dma_semaphore, #tpu.memory_space<semaphore_mem>>
      %135 = tpu.memref_squeeze %134 : memref<1x!tpu.dma_semaphore, #tpu.memory_space<semaphore_mem>> -> memref<!tpu.dma_semaphore, #tpu.memory_space<semaphore_mem>>
      tpu.wait_dma2 semaphore(%135 : memref<!tpu.dma_semaphore, #tpu.memory_space<semaphore_mem>>) src(%132 : memref<1x128xf32, #tpu.memory_space<any>>) dst(%133 : memref<1x128xf32, #tpu.memory_space<vmem>>)
      %c8_i32_92 = arith.constant 8 : i32
      %c0_i32_93 = arith.constant 0 : i32
      %c0_i32_94 = arith.constant 0 : i32
      %136 = tpu.memref_slice %arg3[%c0_i32_93, %c0_i32_94] : memref<32x128xf32, #tpu.memory_space<any>> -> memref<1x128xf32, #tpu.memory_space<any>>
      %c8_i32_95 = arith.constant 8 : i32
      %c0_i32_96 = arith.constant 0 : i32
      %137 = tpu.memref_slice %arg9[%c8_i32_95, %c0_i32_96] : memref<16x128xf32, #tpu.memory_space<vmem>> -> memref<1x128xf32, #tpu.memory_space<vmem>>
      %138 = tpu.memref_slice %arg10[%c8_i32_92] : memref<16x!tpu.dma_semaphore, #tpu.memory_space<semaphore_mem>> -> memref<1x!tpu.dma_semaphore, #tpu.memory_space<semaphore_mem>>
      %139 = tpu.memref_squeeze %138 : memref<1x!tpu.dma_semaphore, #tpu.memory_space<semaphore_mem>> -> memref<!tpu.dma_semaphore, #tpu.memory_space<semaphore_mem>>
      tpu.wait_dma2 semaphore(%139 : memref<!tpu.dma_semaphore, #tpu.memory_space<semaphore_mem>>) src(%136 : memref<1x128xf32, #tpu.memory_space<any>>) dst(%137 : memref<1x128xf32, #tpu.memory_space<vmem>>)
      %c9_i32_97 = arith.constant 9 : i32
      %c0_i32_98 = arith.constant 0 : i32
      %c0_i32_99 = arith.constant 0 : i32
      %140 = tpu.memref_slice %arg3[%c0_i32_98, %c0_i32_99] : memref<32x128xf32, #tpu.memory_space<any>> -> memref<1x128xf32, #tpu.memory_space<any>>
      %c9_i32_100 = arith.constant 9 : i32
      %c0_i32_101 = arith.constant 0 : i32
      %141 = tpu.memref_slice %arg9[%c9_i32_100, %c0_i32_101] : memref<16x128xf32, #tpu.memory_space<vmem>> -> memref<1x128xf32, #tpu.memory_space<vmem>>
      %142 = tpu.memref_slice %arg10[%c9_i32_97] : memref<16x!tpu.dma_semaphore, #tpu.memory_space<semaphore_mem>> -> memref<1x!tpu.dma_semaphore, #tpu.memory_space<semaphore_mem>>
      %143 = tpu.memref_squeeze %142 : memref<1x!tpu.dma_semaphore, #tpu.memory_space<semaphore_mem>> -> memref<!tpu.dma_semaphore, #tpu.memory_space<semaphore_mem>>
      tpu.wait_dma2 semaphore(%143 : memref<!tpu.dma_semaphore, #tpu.memory_space<semaphore_mem>>) src(%140 : memref<1x128xf32, #tpu.memory_space<any>>) dst(%141 : memref<1x128xf32, #tpu.memory_space<vmem>>)
      %c10_i32_102 = arith.constant 10 : i32
      %c0_i32_103 = arith.constant 0 : i32
      %c0_i32_104 = arith.constant 0 : i32
      %144 = tpu.memref_slice %arg3[%c0_i32_103, %c0_i32_104] : memref<32x128xf32, #tpu.memory_space<any>> -> memref<1x128xf32, #tpu.memory_space<any>>
      %c10_i32_105 = arith.constant 10 : i32
      %c0_i32_106 = arith.constant 0 : i32
      %145 = tpu.memref_slice %arg9[%c10_i32_105, %c0_i32_106] : memref<16x128xf32, #tpu.memory_space<vmem>> -> memref<1x128xf32, #tpu.memory_space<vmem>>
      %146 = tpu.memref_slice %arg10[%c10_i32_102] : memref<16x!tpu.dma_semaphore, #tpu.memory_space<semaphore_mem>> -> memref<1x!tpu.dma_semaphore, #tpu.memory_space<semaphore_mem>>
      %147 = tpu.memref_squeeze %146 : memref<1x!tpu.dma_semaphore, #tpu.memory_space<semaphore_mem>> -> memref<!tpu.dma_semaphore, #tpu.memory_space<semaphore_mem>>
      tpu.wait_dma2 semaphore(%147 : memref<!tpu.dma_semaphore, #tpu.memory_space<semaphore_mem>>) src(%144 : memref<1x128xf32, #tpu.memory_space<any>>) dst(%145 : memref<1x128xf32, #tpu.memory_space<vmem>>)
      %c11_i32_107 = arith.constant 11 : i32
      %c0_i32_108 = arith.constant 0 : i32
      %c0_i32_109 = arith.constant 0 : i32
      %148 = tpu.memref_slice %arg3[%c0_i32_108, %c0_i32_109] : memref<32x128xf32, #tpu.memory_space<any>> -> memref<1x128xf32, #tpu.memory_space<any>>
      %c11_i32_110 = arith.constant 11 : i32
      %c0_i32_111 = arith.constant 0 : i32
      %149 = tpu.memref_slice %arg9[%c11_i32_110, %c0_i32_111] : memref<16x128xf32, #tpu.memory_space<vmem>> -> memref<1x128xf32, #tpu.memory_space<vmem>>
      %150 = tpu.memref_slice %arg10[%c11_i32_107] : memref<16x!tpu.dma_semaphore, #tpu.memory_space<semaphore_mem>> -> memref<1x!tpu.dma_semaphore, #tpu.memory_space<semaphore_mem>>
      %151 = tpu.memref_squeeze %150 : memref<1x!tpu.dma_semaphore, #tpu.memory_space<semaphore_mem>> -> memref<!tpu.dma_semaphore, #tpu.memory_space<semaphore_mem>>
      tpu.wait_dma2 semaphore(%151 : memref<!tpu.dma_semaphore, #tpu.memory_space<semaphore_mem>>) src(%148 : memref<1x128xf32, #tpu.memory_space<any>>) dst(%149 : memref<1x128xf32, #tpu.memory_space<vmem>>)
      %c12_i32_112 = arith.constant 12 : i32
      %c0_i32_113 = arith.constant 0 : i32
      %c0_i32_114 = arith.constant 0 : i32
      %152 = tpu.memref_slice %arg3[%c0_i32_113, %c0_i32_114] : memref<32x128xf32, #tpu.memory_space<any>> -> memref<1x128xf32, #tpu.memory_space<any>>
      %c12_i32_115 = arith.constant 12 : i32
      %c0_i32_116 = arith.constant 0 : i32
      %153 = tpu.memref_slice %arg9[%c12_i32_115, %c0_i32_116] : memref<16x128xf32, #tpu.memory_space<vmem>> -> memref<1x128xf32, #tpu.memory_space<vmem>>
      %154 = tpu.memref_slice %arg10[%c12_i32_112] : memref<16x!tpu.dma_semaphore, #tpu.memory_space<semaphore_mem>> -> memref<1x!tpu.dma_semaphore, #tpu.memory_space<semaphore_mem>>
      %155 = tpu.memref_squeeze %154 : memref<1x!tpu.dma_semaphore, #tpu.memory_space<semaphore_mem>> -> memref<!tpu.dma_semaphore, #tpu.memory_space<semaphore_mem>>
      tpu.wait_dma2 semaphore(%155 : memref<!tpu.dma_semaphore, #tpu.memory_space<semaphore_mem>>) src(%152 : memref<1x128xf32, #tpu.memory_space<any>>) dst(%153 : memref<1x128xf32, #tpu.memory_space<vmem>>)
      %c13_i32_117 = arith.constant 13 : i32
      %c0_i32_118 = arith.constant 0 : i32
      %c0_i32_119 = arith.constant 0 : i32
      %156 = tpu.memref_slice %arg3[%c0_i32_118, %c0_i32_119] : memref<32x128xf32, #tpu.memory_space<any>> -> memref<1x128xf32, #tpu.memory_space<any>>
      %c13_i32_120 = arith.constant 13 : i32
      %c0_i32_121 = arith.constant 0 : i32
      %157 = tpu.memref_slice %arg9[%c13_i32_120, %c0_i32_121] : memref<16x128xf32, #tpu.memory_space<vmem>> -> memref<1x128xf32, #tpu.memory_space<vmem>>
      %158 = tpu.memref_slice %arg10[%c13_i32_117] : memref<16x!tpu.dma_semaphore, #tpu.memory_space<semaphore_mem>> -> memref<1x!tpu.dma_semaphore, #tpu.memory_space<semaphore_mem>>
      %159 = tpu.memref_squeeze %158 : memref<1x!tpu.dma_semaphore, #tpu.memory_space<semaphore_mem>> -> memref<!tpu.dma_semaphore, #tpu.memory_space<semaphore_mem>>
      tpu.wait_dma2 semaphore(%159 : memref<!tpu.dma_semaphore, #tpu.memory_space<semaphore_mem>>) src(%156 : memref<1x128xf32, #tpu.memory_space<any>>) dst(%157 : memref<1x128xf32, #tpu.memory_space<vmem>>)
      %c14_i32_122 = arith.constant 14 : i32
      %c0_i32_123 = arith.constant 0 : i32
      %c0_i32_124 = arith.constant 0 : i32
      %160 = tpu.memref_slice %arg3[%c0_i32_123, %c0_i32_124] : memref<32x128xf32, #tpu.memory_space<any>> -> memref<1x128xf32, #tpu.memory_space<any>>
      %c14_i32_125 = arith.constant 14 : i32
      %c0_i32_126 = arith.constant 0 : i32
      %161 = tpu.memref_slice %arg9[%c14_i32_125, %c0_i32_126] : memref<16x128xf32, #tpu.memory_space<vmem>> -> memref<1x128xf32, #tpu.memory_space<vmem>>
      %162 = tpu.memref_slice %arg10[%c14_i32_122] : memref<16x!tpu.dma_semaphore, #tpu.memory_space<semaphore_mem>> -> memref<1x!tpu.dma_semaphore, #tpu.memory_space<semaphore_mem>>
      %163 = tpu.memref_squeeze %162 : memref<1x!tpu.dma_semaphore, #tpu.memory_space<semaphore_mem>> -> memref<!tpu.dma_semaphore, #tpu.memory_space<semaphore_mem>>
      tpu.wait_dma2 semaphore(%163 : memref<!tpu.dma_semaphore, #tpu.memory_space<semaphore_mem>>) src(%160 : memref<1x128xf32, #tpu.memory_space<any>>) dst(%161 : memref<1x128xf32, #tpu.memory_space<vmem>>)
      %c15_i32_127 = arith.constant 15 : i32
      %c0_i32_128 = arith.constant 0 : i32
      %c0_i32_129 = arith.constant 0 : i32
      %164 = tpu.memref_slice %arg3[%c0_i32_128, %c0_i32_129] : memref<32x128xf32, #tpu.memory_space<any>> -> memref<1x128xf32, #tpu.memory_space<any>>
      %c15_i32_130 = arith.constant 15 : i32
      %c0_i32_131 = arith.constant 0 : i32
      %165 = tpu.memref_slice %arg9[%c15_i32_130, %c0_i32_131] : memref<16x128xf32, #tpu.memory_space<vmem>> -> memref<1x128xf32, #tpu.memory_space<vmem>>
      %166 = tpu.memref_slice %arg10[%c15_i32_127] : memref<16x!tpu.dma_semaphore, #tpu.memory_space<semaphore_mem>> -> memref<1x!tpu.dma_semaphore, #tpu.memory_space<semaphore_mem>>
      %167 = tpu.memref_squeeze %166 : memref<1x!tpu.dma_semaphore, #tpu.memory_space<semaphore_mem>> -> memref<!tpu.dma_semaphore, #tpu.memory_space<semaphore_mem>>
      tpu.wait_dma2 semaphore(%167 : memref<!tpu.dma_semaphore, #tpu.memory_space<semaphore_mem>>) src(%164 : memref<1x128xf32, #tpu.memory_space<any>>) dst(%165 : memref<1x128xf32, #tpu.memory_space<vmem>>)
      %c0_132 = arith.constant 0 : index
      %c0_133 = arith.constant 0 : index
      %168 = vector.load %arg9[%c0_132, %c0_133] : memref<16x128xf32, #tpu.memory_space<vmem>>, vector<16x128xf32>
      %169 = arith.truncf %168 : vector<16x128xf32> to vector<16x128xbf16>
      %c0_134 = arith.constant 0 : index
      %c0_135 = arith.constant 0 : index
      %c0_136 = arith.constant 0 : index
      %170 = vector.load %arg4[%c0_134, %c0_135, %c0_136] : memref<1x128x256xbf16, #tpu.memory_space<vmem>>, vector<1x128x256xbf16>
      %171 = vector.shape_cast %170 : vector<1x128x256xbf16> to vector<128x256xbf16>
      %cst = arith.constant dense<0.000000e+00> : vector<16x256xf32>
      %172 = tpu.matmul %169, %171, %cst {dimension_numbers = #tpu.dot_dimension_numbers<[1], [0], [0], [1], [0, 0, 1, 1], [], []>} : vector<16x128xbf16>, vector<128x256xbf16>, vector<16x256xf32> -> vector<16x256xf32>
      %c0_137 = arith.constant 0 : index
      %c0_138 = arith.constant 0 : index
      %c0_139 = arith.constant 0 : index
      %173 = vector.load %arg5[%c0_137, %c0_138, %c0_139] : memref<1x1x256xf32, #tpu.memory_space<vmem>>, vector<1x1x256xf32>
      %174 = vector.shape_cast %173 : vector<1x1x256xf32> to vector<1x256xf32>
      %175 = vector.broadcast %174 : vector<1x256xf32> to vector<16x256xf32>
      %176 = arith.addf %172, %175 : vector<16x256xf32>
      %cst_140 = arith.constant 0.000000e+00 : f32
      %177 = vector.broadcast %cst_140 : f32 to vector<16x256xf32>
      %178 = arith.maximumf %176, %177 : vector<16x256xf32>
      %179 = arith.truncf %178 : vector<16x256xf32> to vector<16x256xbf16>
      %c0_141 = arith.constant 0 : index
      %c0_142 = arith.constant 0 : index
      %c0_143 = arith.constant 0 : index
      %180 = vector.load %arg6[%c0_141, %c0_142, %c0_143] : memref<1x256x128xbf16, #tpu.memory_space<vmem>>, vector<1x256x128xbf16>
      %181 = vector.shape_cast %180 : vector<1x256x128xbf16> to vector<256x128xbf16>
      %cst_144 = arith.constant dense<0.000000e+00> : vector<16x128xf32>
      %182 = tpu.matmul %179, %181, %cst_144 {dimension_numbers = #tpu.dot_dimension_numbers<[1], [0], [0], [1], [0, 0, 1, 1], [], []>} : vector<16x256xbf16>, vector<256x128xbf16>, vector<16x128xf32> -> vector<16x128xf32>
      %c0_145 = arith.constant 0 : index
      %c0_146 = arith.constant 0 : index
      %c0_147 = arith.constant 0 : index
      %183 = vector.load %arg7[%c0_145, %c0_146, %c0_147] : memref<1x1x128xf32, #tpu.memory_space<vmem>>, vector<1x1x128xf32>
      %184 = vector.shape_cast %183 : vector<1x1x128xf32> to vector<1x128xf32>
      %185 = vector.broadcast %184 : vector<1x128xf32> to vector<16x128xf32>
      %186 = arith.addf %182, %185 : vector<16x128xf32>
      %c0_148 = arith.constant 0 : index
      %c0_149 = arith.constant 0 : index
      %c0_150 = arith.constant 0 : index
      %187 = vector.load %arg8[%c0_148, %c0_149, %c0_150] : memref<1x16x128xf32, #tpu.memory_space<vmem>>, vector<1x16x128xf32>
      %188 = vector.shape_cast %187 : vector<1x16x128xf32> to vector<16x128xf32>
      %189 = vector.shape_cast %186 : vector<16x128xf32> to vector<1x16x128xf32>
      tpu.vector_store %arg8[%c0_148, %c0_149, %c0_150], %189 {strides = array<i32>} : memref<1x16x128xf32, #tpu.memory_space<vmem>>, vector<1x16x128xf32>,
    } else {
    }
    return
  }
  func.func @transform_1(%arg0: i32, %arg1: memref<4x16xi32, #tpu.memory_space<smem>>, %arg2: memref<4xi32, #tpu.memory_space<smem>>) -> (i32, i32, i32) {
    %c0_i32 = arith.constant 0 : i32
    %c0_i32_0 = arith.constant 0 : i32
    %c0_i32_1 = arith.constant 0 : i32
    return %arg0, %c0_i32, %c0_i32_0 : i32, i32, i32
  }
  func.func @transform_2(%arg0: i32, %arg1: memref<4x16xi32, #tpu.memory_space<smem>>, %arg2: memref<4xi32, #tpu.memory_space<smem>>) -> (i32, i32, i32) {
    %c0_i32 = arith.constant 0 : i32
    %c0_i32_0 = arith.constant 0 : i32
    %c0_i32_1 = arith.constant 0 : i32
    return %arg0, %c0_i32, %c0_i32_0 : i32, i32, i32
  }
  func.func @transform_3(%arg0: i32, %arg1: memref<4x16xi32, #tpu.memory_space<smem>>, %arg2: memref<4xi32, #tpu.memory_space<smem>>) -> (i32, i32, i32) {
    %c0_i32 = arith.constant 0 : i32
    %c0_i32_0 = arith.constant 0 : i32
    %c0_i32_1 = arith.constant 0 : i32
    return %arg0, %c0_i32, %c0_i32_0 : i32, i32, i32
  }
  func.func @transform_4(%arg0: i32, %arg1: memref<4x16xi32, #tpu.memory_space<smem>>, %arg2: memref<4xi32, #tpu.memory_space<smem>>) -> (i32, i32, i32) {
    %c0_i32 = arith.constant 0 : i32
    %c0_i32_0 = arith.constant 0 : i32
    %c0_i32_1 = arith.constant 0 : i32
    return %arg0, %c0_i32, %c0_i32_0 : i32, i32, i32
  }
  func.func @transform_5(%arg0: i32, %arg1: memref<4x16xi32, #tpu.memory_space<smem>>, %arg2: memref<4xi32, #tpu.memory_space<smem>>) -> (i32, i32, i32) {
    %c0_i32 = arith.constant 0 : i32
    %c0_i32_0 = arith.constant 0 : i32
    %c0_i32_1 = arith.constant 0 : i32
    return %arg0, %c0_i32, %c0_i32_0 : i32, i32, i32
  }
}

</mosaic_0001>

<bundles_post_ra>
// kernel: moe_ep_forward.3
= control target key start
LH: loop header
LB: loop body
LE: loop exit
PB: predicated region body
PF: predicated region fallthrough
CT: control target
= control target key end

     0   :  { %s783_s15 = smov [#allocation5]   ;;  %s936_s0 = inlined_call_operand.vmem [shape: s32[32], index: 0, kind: input, shape index: {}]   ;;  %s937_s1 = inlined_call_operand.vmem [shape: f32[32,1], index: 1, kind: input, shape index: {}]   ;;  %s938_s2 = inlined_call_operand.vmem [shape: f32[64,128], index: 2, kind: input, shape index: {}]   ;;  %s939_s3 = inlined_call_operand.hbm [shape: f32[32,128], index: 3, kind: output, shape index: {}]  }
   0x1   :  { %s9_s14 = sshll.u32 %s936_s0, 4  ;;  %s10_s14 = int_to_ptr.vmem [resolvable:$true] %s9_s14 }
   0x2   :  { %12 = dma.vmem_to_smem %s10_s14, 16, %s783_s15, [#allocation4] }
   0x3   :  { %745 = dma.done.wait [#allocation4], 16 }
   0x4   :  { %746 = vsyncadd [#allocation4], 4294967280 }
   0x5   :  { %15 = sfence }
   0x6   :  { %16 = vsyncpa [#allocation7], 0 }
   0x7   :  { %18 = vsyncpa [#allocation7 + $0x1], 0  ;;  %s808_s16 = smov 0   ;;  %s810_s17 = smov 0  }
   0x8   :  { %s812_s18 = smov 0   ;;  %s814_s19 = smov 0  }
   0x9 LB: > { %s627_s0 = sadd.s32 4294967295, %s781_s19   ;;  %s628_s20 = sadd.s32 4294967294, %s781_s19   ;;  %s781_s19 = sphi %s814_s19, %s945_s19   ;;  %s777_s18 = sphi %s812_s18, %s944_s18   ;;  %s773_s17 = sphi %s810_s17, %s943_s17   ;;  %s769_s16 = sphi %s808_s16, %s942_s16  }
   0xa   : > { %s831_s21 = sadd.s32 1, %s781_s19   ;;  %s57_s22 = sadd.s32 1, %s777_s18 }
   0xb   : > { %s54_s23 = ssub.s32 %s781_s19, %s831_s21  ;;  %p67_p0 = scmp.ne.s32.totalorder %s777_s18, %s773_s17 }
   0xc   : > { %p55_p1 = scmp.eq.s32.totalorder %s54_s23, 0  ;;  %p68_p2 = scmp.eq.s32.totalorder %s627_s0, 3 }
   0xd   : > { %p73_p3 = scmp.ne.s32.totalorder %s773_s17, %s769_s16  ;;  %p74_p4 = scmp.eq.s32.totalorder %s628_s20, 3 }
   0xe   : > { %s841_s24 = scalar_select %p55_p1, %s777_s18, %s57_s22  }
   0xf   : > { %p843_p5 = por %p68_p2, %p67_p0  ;;  %p847_p6 = por %p74_p4, %p73_p3 }
  0x10   : > { %p631_p7 = scmp.ge.s32.totalorder %s781_s19, 1  ;;  %p99_p8 = scmp.lt.s32.totalorder %s781_s19, 5 }
  0x12   : > { %p100_p9 = pnand %p631_p7, %p99_p8 }
  0x13   : > { %s115_s27 = sand.u32 (!%p100_p9), 1, %s773_s17   ;;  %p118_p10 = scmp.lt.s32.totalorder (!%p100_p9), %s627_s0, 3 }
  0x14   : > { %103 = sbr.rel (%p100_p9) target bundleno = 239 (0xef), region = 24  ;;  %s856_s28 = sshll.u32 (!%p100_p9), %s115_s27, 3 }
  0x15   : > { %s858_s29 = sshll.u32 (!%p100_p9), %s627_s0, 3  ;;  %s117_s11 = scalar_lea.vmem (!%p100_p9), [#allocation6], %s856_s28 }
  0x16   : > { %s123_s30 = sld [smem:[#allocation5 + %s858_s29]] (!%p100_p9) }
  0x19   : > { %s947_s0 = smov (!%p118_p10, %s627_s0), 3 }
  0x1a   : > { %s633_s4 = sshll.u32 %s947_s0, 3 }
  0x1b   : > { %s864_s7 = scalar_lea.vmem %s937_s1, %s633_s4 }
  0x1c   : > { %s124_s10 = scalar_lea.vmem %s938_s2, %s123_s30 }
  0x1d   : > { %v139_v0 = vld [vmem:[%s124_s10] sm:$0x1] }
  0x1e   : > { %140 = vst [vmem:[#allocation2] sm:$0x1] %v139_v0 }
  0x1f   : > { %158 = vsyncadd [#allocation3], 16  ;;  %s159_s12 = sadd.s32 1, %s858_s29 }
  0x20   : > { %s160_s13 = sld [smem:[#allocation5 + %s159_s12]] }
  0x26   : > { %s161_s0 = scalar_lea.vmem %s938_s2, %s160_s13 }
  0x27   : > { %v178_v1 = vld [vmem:[%s161_s0] sm:$0x1] }
  0x28   : > { %179 = vst [vmem:[#allocation2 + $0x1] sm:$0x1] %v178_v1 }
  0x29   : > { %197 = vsyncadd [#allocation3 + $0x1], 16  ;;  %s198_s20 = sadd.s32 2, %s858_s29 }
  0x2a   : > { %s199_s22 = sld [smem:[#allocation5 + %s198_s20]] }
  0x30   : > { %s200_s30 = scalar_lea.vmem %s938_s2, %s199_s22 }
  0x31   : > { %v217_v2 = vld [vmem:[%s200_s30] sm:$0x1] }
  0x32   : > { %218 = vst [vmem:[#allocation2 + $0x2] sm:$0x1] %v217_v2 }
  0x33   : > { %236 = vsyncadd [#allocation3 + $0x2], 16  ;;  %s237_s5 = sadd.s32 3, %s858_s29 }
  0x34   : > { %s238_s6 = sld [smem:[#allocation5 + %s237_s5]] }
  0x3a   : > { %s239_s10 = scalar_lea.vmem %s938_s2, %s238_s6 }
  0x3b   : > { %v256_v3 = vld [vmem:[%s239_s10] sm:$0x1] }
  0x3c   : > { %257 = vst [vmem:[#allocation2 + $0x3] sm:$0x1] %v256_v3 }
  0x3d   : > { %275 = vsyncadd [#allocation3 + $0x3], 16  ;;  %s276_s12 = sadd.s32 4, %s858_s29 }
  0x3e   : > { %s277_s13 = sld [smem:[#allocation5 + %s276_s12]] }
  0x44   : > { %s278_s0 = scalar_lea.vmem %s938_s2, %s277_s13 }
  0x45   : > { %v295_v4 = vld [vmem:[%s278_s0] sm:$0x1] }
  0x46   : > { %296 = vst [vmem:[#allocation2 + $0x4] sm:$0x1] %v295_v4 }
  0x47   : > { %314 = vsyncadd [#allocation3 + $0x4], 16  ;;  %s315_s20 = sadd.s32 5, %s858_s29 }
  0x48   : > { %s316_s22 = sld [smem:[#allocation5 + %s315_s20]] }
  0x4e   : > { %s317_s30 = scalar_lea.vmem %s938_s2, %s316_s22 }
  0x4f   : > { %v334_v5 = vld [vmem:[%s317_s30] sm:$0x1] }
  0x50   : > { %335 = vst [vmem:[#allocation2 + $0x5] sm:$0x1] %v334_v5 }
  0x51   : > { %353 = vsyncadd [#allocation3 + $0x5], 16  ;;  %s354_s5 = sadd.s32 6, %s858_s29 }
  0x52   : > { %s355_s6 = sld [smem:[#allocation5 + %s354_s5]] }
  0x58   : > { %s356_s10 = scalar_lea.vmem %s938_s2, %s355_s6 }
  0x59   : > { %v373_v6 = vld [vmem:[%s356_s10] sm:$0x1] }
  0x5a   : > { %374 = vst [vmem:[#allocation2 + $0x6] sm:$0x1] %v373_v6 }
  0x5b   : > { %392 = vsyncadd [#allocation3 + $0x6], 16  ;;  %s393_s12 = sadd.s32 7, %s858_s29 }
  0x5c   : > { %s394_s13 = sld [smem:[#allocation5 + %s393_s12]] }
  0x62   : > { %s395_s0 = scalar_lea.vmem %s938_s2, %s394_s13 }
  0x63   : > { %v412_v7 = vld [vmem:[%s395_s0] sm:$0x1] }
  0x64   : > { %413 = vst [vmem:[#allocation2 + $0x7] sm:$0x1] %v412_v7 }
  0x65   : > { %431 = vsyncadd [#allocation3 + $0x7], 16 }
  0x66   : > { %747 = dma.done.wait [#allocation3], 16 }
  0x67   : > { %748 = vsyncadd [#allocation3], 4294967280 }
  0x68   : > { %749 = dma.done.wait [#allocation3 + $0x1], 16 }
  0x69   : > { %750 = vsyncadd [#allocation3 + $0x1], 4294967280 }
  0x6a   : > { %751 = dma.done.wait [#allocation3 + $0x2], 16 }
  0x6b   : > { %752 = vsyncadd [#allocation3 + $0x2], 4294967280 }
  0x6c   : > { %753 = dma.done.wait [#allocation3 + $0x3], 16 }
  0x6d   : > { %754 = vsyncadd [#allocation3 + $0x3], 4294967280 }
  0x6e   : > { %755 = dma.done.wait [#allocation3 + $0x4], 16 }
  0x6f   : > { %756 = vsyncadd [#allocation3 + $0x4], 4294967280 }
  0x70   : > { %757 = dma.done.wait [#allocation3 + $0x5], 16 }
  0x71   : > { %758 = vsyncadd [#allocation3 + $0x5], 4294967280 }
  0x72   : > { %759 = dma.done.wait [#allocation3 + $0x6], 16 }
  0x73   : > { %760 = vsyncadd [#allocation3 + $0x6], 4294967280 }
  0x74   : > { %761 = dma.done.wait [#allocation3 + $0x7], 16 }
  0x75   : > { %762 = vsyncadd [#allocation3 + $0x7], 4294967280  ;;  %v784_v8 = vmov 0   ;;  %v449_v9 = vld [vmem:[%s864_s7] sm:$0xff]  ;;  %s469_s23 = scalar_lea.hbm %s939_s3, %s858_s29  ;;  %s471_s4 = sshll.u32 %s117_s11, 4  ;;  %s472_s4 = int_to_ptr.vmem [resolvable:$true] %s471_s4 }
  0x76   : > { %688 = vset.pattern.permute.xlu0 %v784_v8  ;;  %v450_v10 = vld [vmem:[#allocation2] sm:$0xff]  ;;  %s473_s30 = sshll.u32 %s469_s23, 4  ;;  %s459_s5 = scalar_lea.sflag [#allocation7], %s115_s27  ;;  %s474_s30 = int_to_ptr.hbm [resolvable:$true] %s473_s30 }
  0x77   : > { %453 = vperm.xlu0 %688, %v449_v9   ;;  %s715_s6 = sshra.s32 %s474_s30, 4  ;;  %s721_s9 = scalar_lea.hbm %s939_s3, 32  ;;  %s716_s6 = int_to_ptr.hbm [resolvable:$true] %s715_s6 }
  0x78   : > { %s717_s7 = scalar_lea.hbm %s716_s6, 8  ;;  %p722_p0 = scmp.lt.s32.totalorder %s716_s6, %s939_s3 }
  0x79   : > { %p718_p11 = scmp.ne.s32.totalorder %s716_s6, %s717_s7  ;;  %p723_p1 = scmp.lt.s32.totalorder %s721_s9, %s717_s7 }
  0x7b   : > { %p719_p12 = pnand %p718_p11, %p843_p5  ;;  %p724_p2 = por %p723_p1, %p722_p0 }
  0x7d   : > { %p720_p13 = pneg %p719_p12 }
  0x7f   : > { %p725_p3 = pnand %p724_p2, %p720_p13 }
  0xe9   : > { %v454_v11 = vpop.permute.xlu0 %453 }
  0xea   : > { %v456_v12 = vmul.f32 %v454_v11, %v450_v10 }
  0xec   : > { %457 = vst [vmem:[%s117_s11] sm:$0xff] %v456_v12 }
  0xed   : > { %728 = shalt.err (!%p725_p3)
}
  0xee   : > { %647 = dma.vmem_to_hbm [thread:$0]  (%p843_p5), %s472_s4, 128, %s474_s30, %s459_s5  }
  0xef PF: > { %p653_p4 = scmp.ge.s32.totalorder %s781_s19, 2  ;;  %s485_s27 = sand.u32 1, %s769_s16  }
  0xf0   : > { %s486_s28 = scalar_lea.sflag [#allocation7], %s485_s27 }
  0xf1   : > { %p650_p7 = pnand %p653_p4, %p847_p6 }
  0xf3   : > { %p651_p8 = pneg %p650_p7 }
  0xf5   : > { %764 = dma.done.wait (%p651_p8), %s486_s28, 128  }
  0xf6   : > { %766 = vsyncadd (%p651_p8), %s486_s28, 4294967168  ;;  %p21_p9 = scmp.ge.s32.totalorder %s831_s21, 6   ;;  %s942_s16 = smov %s773_s17 }
  0xf7   : > { %s943_s17 = smov %s777_s18  ;;  %s944_s18 = smov %s841_s24 }
  0xf8   : > { %s945_s19 = smov %s831_s21  ;;  %23 = sbr.rel (!%p21_p9) target bundleno = 9 (0x9), region = 360 }
  0xfd   :  { %492 = vsyncpa [#allocation7], 1 }
  0xfe   :  { %494 = vsyncpa [#allocation7 + $0x1], 1 }
  0xff   :  { %495 = vsyncmov [#allocation3] }
 0x102   :  { %s496_s19 = vpop.sfrf %495 }
 0x103   :  { %p639_p5 = scmp.ne.s32.totalorder %s496_s19, 0 }
 0x105   :  { %500 = shalt.err (%p639_p5)  }
 0x106   :  { %502 = vsyncmov [#allocation3 + $0x1] }
 0x109   :  { %s503_s25 = vpop.sfrf %502 }
 0x10a   :  { %p640_p6 = scmp.ne.s32.totalorder %s503_s25, 0 }
 0x10c   :  { %507 = shalt.err (%p640_p6)  }
 0x10d   :  { %509 = vsyncmov [#allocation3 + $0x2] }
 0x110   :  { %s510_s26 = vpop.sfrf %509 }
 0x111   :  { %p641_p10 = scmp.ne.s32.totalorder %s510_s26, 0 }
 0x113   :  { %514 = shalt.err (%p641_p10)  }
 0x114   :  { %516 = vsyncmov [#allocation3 + $0x3] }
 0x117   :  { %s517_s11 = vpop.sfrf %516 }
 0x118   :  { %p642_p11 = scmp.ne.s32.totalorder %s517_s11, 0 }
 0x11a   :  { %521 = shalt.err (%p642_p11)  }
 0x11b   :  { %523 = vsyncmov [#allocation3 + $0x4] }
 0x11e   :  { %s524_s21 = vpop.sfrf %523 }
 0x11f   :  { %p643_p12 = scmp.ne.s32.totalorder %s524_s21, 0 }
 0x121   :  { %528 = shalt.err (%p643_p12)  }
 0x122   :  { %530 = vsyncmov [#allocation3 + $0x5] }
 0x125   :  { %s531_s1 = vpop.sfrf %530 }
 0x126   :  { %p644_p13 = scmp.ne.s32.totalorder %s531_s1, 0 }
 0x128   :  { %535 = shalt.err (%p644_p13)  }
 0x129   :  { %537 = vsyncmov [#allocation3 + $0x6] }
 0x12c   :  { %s538_s2 = vpop.sfrf %537 }
 0x12d   :  { %p645_p0 = scmp.ne.s32.totalorder %s538_s2, 0 }
 0x12f   :  { %542 = shalt.err (%p645_p0)  }
 0x130   :  { %544 = vsyncmov [#allocation3 + $0x7] }
 0x133   :  { %s545_s3 = vpop.sfrf %544 }
 0x134   :  { %p646_p1 = scmp.ne.s32.totalorder %s545_s3, 0 }
 0x136   :  { %549 = shalt.err (%p646_p1)  }

// kernel: moe_ep_forward.2
= control target key start
LH: loop header
LB: loop body
LE: loop exit
PB: predicated region body
PF: predicated region fallthrough
CT: control target
= control target key end

     0   :  { %s1785_s30 = smov [#allocation5]   ;;  %s1786_s8 = smov [#allocation6]   ;;  %s1998_s0 = inlined_call_operand.vmem [shape: s32[4,16], index: 0, kind: input, shape index: {}]   ;;  %s1999_s2 = inlined_call_operand.vmem [shape: f32[32,128], index: 2, kind: input, shape index: {}]   ;;  %s2000_s3 = inlined_call_operand.vmem [shape: bf16[4,128,256], index: 3, kind: input, shape index: {}]   ;;  %s2001_s4 = inlined_call_operand.vmem [shape: f32[4,1,256], index: 4, kind: input, shape index: {}]   ;;  %s2002_s5 = inlined_call_operand.vmem [shape: bf16[4,256,128], index: 5, kind: input, shape index: {}]   ;;  %s2003_s6 = inlined_call_operand.vmem [shape: f32[4,1,128], index: 6, kind: input, shape index: {}]   ;;  %s2004_s7 = inlined_call_operand.vmem [shape: f32[4,16,128], index: 7, kind: output, shape index: {}]   ;;  %s2005_s1 = inlined_call_operand.vmem [shape: s32[4], index: 1, kind: input, shape index: {}]  }
   0x1   :  { %s13_s26 = sshll.u32 %s1998_s0, 4  ;;  %s18_s29 = sshll.u32 %s2005_s1, 4  ;;  %s14_s26 = int_to_ptr.vmem [resolvable:$true] %s13_s26  ;;  %s19_s29 = int_to_ptr.vmem [resolvable:$true] %s18_s29 }
   0x2   :  { %16 = dma.vmem_to_smem %s14_s26, 64, %s1785_s30, [#allocation4] }
   0x3   :  { %21 = dma.vmem_to_smem %s19_s29, 16, %s1786_s8, [#allocation4] }
   0x4   :  { %1747 = dma.done.wait [#allocation4], 80 }
   0x5   :  { %1748 = vsyncadd [#allocation4], 4294967216 }
   0x6   :  { %24 = sfence }
   0x7   :  { %s1834_s9 = smov 0  }
   0x8 LB: > { %s1511_s0 = sadd.s32 4294967295, %s1783_s9   ;;  %p1515_p0 = scmp.ge.s32.totalorder %s1783_s9, 1  ;;  %s1783_s9 = sphi %s1834_s9, %s30_s9  }
   0x9   : > { %p205_p1 = scmp.lt.s32.totalorder %s1783_s9, 5 }
   0xb   : > { %p206_p2 = pnand %p1515_p0, %p205_p1 }
   0xc   : > { %p243_p3 = scmp.lt.s32.totalorder (!%p206_p2), %s1511_s0, 3  ;;  %s265_s1 = sld [smem:[#allocation6 + %s1511_s0]] (!%p206_p2) }
   0xd   : > { %209 = sbr.rel (%p206_p2) target bundleno = 543 (0x21f), region = 36 }
  0x12   : > { %s1842_s10 = scalar_select %p243_p3, %s1511_s0, 3 }
  0x13   : > { %p1523_p4 = scmp.ne.s32.totalorder %s265_s1, 0 }
  0x14   : > { %s1672_s11 = sshll.u32 %s1842_s10, 7  ;;  %s1518_s12 = sshll.u32 %s1842_s10, 1 }
  0x15   : > { %s1849_s15 = scalar_lea.vmem %s2000_s3, %s1672_s11  ;;  %s1854_s18 = scalar_lea.vmem %s2001_s4, %s1518_s12 }
  0x16   : > { %s1859_s21 = scalar_lea.vmem %s2002_s5, %s1672_s11  ;;  %s259_s24 = scalar_lea.vmem %s2003_s6, %s1842_s10 }
  0x17   : > { %s1674_s25 = sshll.u32 %s1842_s10, 4  ;;  %269 = sbr.rel (%p1523_p4) target bundleno = 31 (0x1f), region = 40 }
  0x18   : > { %s1869_s28 = scalar_lea.vmem %s2004_s7, %s1674_s25 }
  0x1c   : > { %v1787_v0 = vmov 0.0  }
  0x1d   : > { %270 = vst [vmem:[%s1869_s28] sm:$0xff] %v1787_v0 }
  0x1e   : > { %271 = vst [vmem:[%s1869_s28 + $0x8] sm:$0xff] %v1787_v0 }
  0x1f PF: > { %p1524_p5 = scmp.le.s32.totalorder %s265_s1, 0 }
  0x20   : > { %s1873_s29 = sshll.u32 (!%p1524_p5), %s1511_s0, 7 }
  0x21   : > { %275 = sbr.rel (%p1524_p5) target bundleno = 543 (0x21f), region = 44  ;;  %s277_s30 = sld [smem:[#allocation5 + %s1873_s29]] (!%p1524_p5) }
  0x27   : > { %s278_s12 = scalar_lea.vmem %s1999_s2, %s277_s30 }
  0x28   : > { %v293_v1 = vld [vmem:[%s278_s12] sm:$0x1] }
  0x29   : > { %294 = vst [vmem:[#allocation2] sm:$0x1] %v293_v1 }
  0x2a   : > { %312 = vsyncadd [#allocation3], 16  ;;  %s313_s13 = sadd.s32 1, %s1873_s29 }
  0x2b   : > { %s314_s14 = sld [smem:[#allocation5 + %s313_s13]] }
  0x31   : > { %s315_s19 = scalar_lea.vmem %s1999_s2, %s314_s14 }
  0x32   : > { %v332_v2 = vld [vmem:[%s315_s19] sm:$0x1] }
  0x33   : > { %333 = vst [vmem:[#allocation2 + $0x1] sm:$0x1] %v332_v2 }
  0x34   : > { %351 = vsyncadd [#allocation3 + $0x1], 16  ;;  %s352_s0 = sadd.s32 2, %s1873_s29 }
  0x35   : > { %s353_s1 = sld [smem:[#allocation5 + %s352_s0]] }
  0x3b   : > { %s354_s23 = scalar_lea.vmem %s1999_s2, %s353_s1 }
  0x3c   : > { %v371_v3 = vld [vmem:[%s354_s23] sm:$0x1] }
  0x3d   : > { %372 = vst [vmem:[#allocation2 + $0x2] sm:$0x1] %v371_v3 }
  0x3e   : > { %390 = vsyncadd [#allocation3 + $0x2], 16  ;;  %s391_s25 = sadd.s32 3, %s1873_s29 }
  0x3f   : > { %s392_s26 = sld [smem:[#allocation5 + %s391_s25]] }
  0x45   : > { %s393_s8 = scalar_lea.vmem %s1999_s2, %s392_s26 }
  0x46   : > { %v410_v4 = vld [vmem:[%s393_s8] sm:$0x1] }
  0x47   : > { %411 = vst [vmem:[#allocation2 + $0x3] sm:$0x1] %v410_v4 }
  0x48   : > { %429 = vsyncadd [#allocation3 + $0x3], 16  ;;  %s430_s11 = sadd.s32 4, %s1873_s29 }
  0x49   : > { %s431_s12 = sld [smem:[#allocation5 + %s430_s11]] }
  0x4f   : > { %s432_s16 = scalar_lea.vmem %s1999_s2, %s431_s12 }
  0x50   : > { %v449_v5 = vld [vmem:[%s432_s16] sm:$0x1] }
  0x51   : > { %450 = vst [vmem:[#allocation2 + $0x4] sm:$0x1] %v449_v5 }
  0x52   : > { %468 = vsyncadd [#allocation3 + $0x4], 16  ;;  %s469_s17 = sadd.s32 5, %s1873_s29 }
  0x53   : > { %s470_s19 = sld [smem:[#allocation5 + %s469_s17]] }
  0x59   : > { %s471_s20 = scalar_lea.vmem %s1999_s2, %s470_s19 }
  0x5a   : > { %v488_v6 = vld [vmem:[%s471_s20] sm:$0x1] }
  0x5b   : > { %489 = vst [vmem:[#allocation2 + $0x5] sm:$0x1] %v488_v6 }
  0x5c   : > { %507 = vsyncadd [#allocation3 + $0x5], 16  ;;  %s508_s22 = sadd.s32 6, %s1873_s29 }
  0x5d   : > { %s509_s23 = sld [smem:[#allocation5 + %s508_s22]] }
  0x63   : > { %s510_s27 = scalar_lea.vmem %s1999_s2, %s509_s23 }
  0x64   : > { %v527_v7 = vld [vmem:[%s510_s27] sm:$0x1] }
  0x65   : > { %528 = vst [vmem:[#allocation2 + $0x6] sm:$0x1] %v527_v7 }
  0x66   : > { %546 = vsyncadd [#allocation3 + $0x6], 16  ;;  %s547_s30 = sadd.s32 7, %s1873_s29 }
  0x67   : > { %s548_s8 = sld [smem:[#allocation5 + %s547_s30]] }
  0x6d   : > { %s549_s13 = scalar_lea.vmem %s1999_s2, %s548_s8 }
  0x6e   : > { %v566_v8 = vld [vmem:[%s549_s13] sm:$0x1] }
  0x6f   : > { %567 = vst [vmem:[#allocation2 + $0x7] sm:$0x1] %v566_v8 }
  0x70   : > { %585 = vsyncadd [#allocation3 + $0x7], 16  ;;  %s586_s14 = sadd.s32 8, %s1873_s29 }
  0x71   : > { %s587_s16 = sld [smem:[#allocation5 + %s586_s14]] }
  0x77   : > { %s588_s0 = scalar_lea.vmem %s1999_s2, %s587_s16 }
  0x78   : > { %v605_v9 = vld [vmem:[%s588_s0] sm:$0x1] }
  0x79   : > { %606 = vst [vmem:[#allocation2 + $0x8] sm:$0x1] %v605_v9 }
  0x7a   : > { %624 = vsyncadd [#allocation3 + $0x8], 16  ;;  %s625_s1 = sadd.s32 9, %s1873_s29 }
  0x7b   : > { %s626_s20 = sld [smem:[#allocation5 + %s625_s1]] }
  0x81   : > { %s627_s25 = scalar_lea.vmem %s1999_s2, %s626_s20 }
  0x82   : > { %v644_v10 = vld [vmem:[%s627_s25] sm:$0x1] }
  0x83   : > { %645 = vst [vmem:[#allocation2 + $0x9] sm:$0x1] %v644_v10 }
  0x84   : > { %663 = vsyncadd [#allocation3 + $0x9], 16  ;;  %s664_s26 = sadd.s32 10, %s1873_s29 }
  0x85   : > { %s665_s27 = sld [smem:[#allocation5 + %s664_s26]] }
  0x8b   : > { %s666_s11 = scalar_lea.vmem %s1999_s2, %s665_s27 }
  0x8c   : > { %v683_v11 = vld [vmem:[%s666_s11] sm:$0x1] }
  0x8d   : > { %684 = vst [vmem:[#allocation2 + $0xa] sm:$0x1] %v683_v11 }
  0x8e   : > { %702 = vsyncadd [#allocation3 + $0xa], 16  ;;  %s703_s12 = sadd.s32 11, %s1873_s29 }
  0x8f   : > { %s704_s13 = sld [smem:[#allocation5 + %s703_s12]] }
  0x95   : > { %s705_s17 = scalar_lea.vmem %s1999_s2, %s704_s13 }
  0x96   : > { %v722_v12 = vld [vmem:[%s705_s17] sm:$0x1] }
  0x97   : > { %723 = vst [vmem:[#allocation2 + $0xb] sm:$0x1] %v722_v12 }
  0x98   : > { %741 = vsyncadd [#allocation3 + $0xb], 16  ;;  %s742_s19 = sadd.s32 12, %s1873_s29 }
  0x99   : > { %s743_s0 = sld [smem:[#allocation5 + %s742_s19]] }
  0x9f   : > { %s744_s22 = scalar_lea.vmem %s1999_s2, %s743_s0 }
  0xa0   : > { %v761_v13 = vld [vmem:[%s744_s22] sm:$0x1] }
  0xa1   : > { %762 = vst [vmem:[#allocation2 + $0xc] sm:$0x1] %v761_v13 }
  0xa2   : > { %780 = vsyncadd [#allocation3 + $0xc], 16  ;;  %s781_s23 = sadd.s32 13, %s1873_s29 }
  0xa3   : > { %s782_s25 = sld [smem:[#allocation5 + %s781_s23]] }
  0xa9   : > { %s783_s30 = scalar_lea.vmem %s1999_s2, %s782_s25 }
  0xaa   : > { %v800_v14 = vld [vmem:[%s783_s30] sm:$0x1] }
  0xab   : > { %801 = vst [vmem:[#allocation2 + $0xd] sm:$0x1] %v800_v14 }
  0xac   : > { %819 = vsyncadd [#allocation3 + $0xd], 16  ;;  %s820_s8 = sadd.s32 14, %s1873_s29 }
  0xad   : > { %s821_s11 = sld [smem:[#allocation5 + %s820_s8]] }
  0xb3   : > { %s822_s14 = scalar_lea.vmem %s1999_s2, %s821_s11 }
  0xb4   : > { %v839_v15 = vld [vmem:[%s822_s14] sm:$0x1] }
  0xb5   : > { %840 = vst [vmem:[#allocation2 + $0xe] sm:$0x1] %v839_v15 }
  0xb6   : > { %858 = vsyncadd [#allocation3 + $0xe], 16  ;;  %s859_s16 = sadd.s32 15, %s1873_s29 }
  0xb7   : > { %s860_s17 = sld [smem:[#allocation5 + %s859_s16]] }
  0xbd   : > { %s861_s1 = scalar_lea.vmem %s1999_s2, %s860_s17 }
  0xbe   : > { %v878_v16 = vld [vmem:[%s861_s1] sm:$0x1] }
  0xbf   : > { %879 = vst [vmem:[#allocation2 + $0xf] sm:$0x1] %v878_v16 }
  0xc0   : > { %897 = vsyncadd [#allocation3 + $0xf], 16 }
  0xc1   : > { %1749 = dma.done.wait [#allocation3], 16 }
  0xc2   : > { %1750 = vsyncadd [#allocation3], 4294967280 }
  0xc3   : > { %1751 = dma.done.wait [#allocation3 + $0x1], 16 }
  0xc4   : > { %1752 = vsyncadd [#allocation3 + $0x1], 4294967280 }
  0xc5   : > { %1753 = dma.done.wait [#allocation3 + $0x2], 16 }
  0xc6   : > { %1754 = vsyncadd [#allocation3 + $0x2], 4294967280 }
  0xc7   : > { %1755 = dma.done.wait [#allocation3 + $0x3], 16 }
  0xc8   : > { %1756 = vsyncadd [#allocation3 + $0x3], 4294967280 }
  0xc9   : > { %1757 = dma.done.wait [#allocation3 + $0x4], 16 }
  0xca   : > { %1758 = vsyncadd [#allocation3 + $0x4], 4294967280 }
  0xcb   : > { %1759 = dma.done.wait [#allocation3 + $0x5], 16 }
  0xcc   : > { %1760 = vsyncadd [#allocation3 + $0x5], 4294967280 }
  0xcd   : > { %1761 = dma.done.wait [#allocation3 + $0x6], 16 }
  0xce   : > { %1762 = vsyncadd [#allocation3 + $0x6], 4294967280 }
  0xcf   : > { %1763 = dma.done.wait [#allocation3 + $0x7], 16 }
  0xd0   : > { %1764 = vsyncadd [#allocation3 + $0x7], 4294967280 }
  0xd1   : > { %1765 = dma.done.wait [#allocation3 + $0x8], 16 }
  0xd2   : > { %1766 = vsyncadd [#allocation3 + $0x8], 4294967280 }
  0xd3   : > { %1767 = dma.done.wait [#allocation3 + $0x9], 16 }
  0xd4   : > { %1768 = vsyncadd [#allocation3 + $0x9], 4294967280 }
  0xd5   : > { %1769 = dma.done.wait [#allocation3 + $0xa], 16 }
  0xd6   : > { %1770 = vsyncadd [#allocation3 + $0xa], 4294967280 }
  0xd7   : > { %1771 = dma.done.wait [#allocation3 + $0xb], 16 }
  0xd8   : > { %1772 = vsyncadd [#allocation3 + $0xb], 4294967280 }
  0xd9   : > { %1773 = dma.done.wait [#allocation3 + $0xc], 16 }
  0xda   : > { %1774 = vsyncadd [#allocation3 + $0xc], 4294967280 }
  0xdb   : > { %1775 = dma.done.wait [#allocation3 + $0xd], 16 }
  0xdc   : > { %1776 = vsyncadd [#allocation3 + $0xd], 4294967280 }
  0xdd   : > { %1777 = dma.done.wait [#allocation3 + $0xe], 16 }
  0xde   : > { %1778 = vsyncadd [#allocation3 + $0xe], 4294967280 }
  0xdf   : > { %1779 = dma.done.wait [#allocation3 + $0xf], 16 }
  0xe0   : > { %1780 = vsyncadd [#allocation3 + $0xf], 4294967280  ;;  %v1584_v17 = vld [vmem:[%s1849_s15 + $0x70] sm:$0xf]  ;;  %v1690_v18 = vld [vmem:[%s1849_s15 + $0x74] sm:$0xf0] }
  0xe1   : > { %v1689_v19 = vld [vmem:[%s1849_s15 + $0x74] sm:$0xf]  ;;  %v1585_v20 = vor.u32 %v1690_v18, %v1584_v17  ;;  %v1586_v21 = vld [vmem:[%s1849_s15 + $0x78] sm:$0xf0]  ;;  %v1576_v22 = vld [vmem:[%s1849_s15 + $0x60] sm:$0xf] }
  0xe2   : > { %v1688_v23 = vld [vmem:[%s1849_s15 + $0x64] sm:$0xf0]  ;;  %v1589_v24 = vor.u32 %v1689_v19, %v1586_v21  ;;  %v1687_v25 = vld [vmem:[%s1849_s15 + $0x64] sm:$0xf]  ;;  %v1578_v26 = vld [vmem:[%s1849_s15 + $0x68] sm:$0xf0] }
  0xe3   : > { %1036 = vmatpush.bf16.msra.mxu0 %v1585_v20  ;;  %v1577_v27 = vor.u32 %v1688_v23, %v1576_v22  ;;  %v1581_v28 = vor.u32 %v1687_v25, %v1578_v26  ;;  %v1568_v29 = vld [vmem:[%s1849_s15 + $0x50] sm:$0xf]  ;;  %v1686_v30 = vld [vmem:[%s1849_s15 + $0x54] sm:$0xf0]  ;;  %v1685_v31 = vld [vmem:[%s1849_s15 + $0x54] sm:$0xf] }
  0xe4   : > { %1050 = vmatpush.bf16.msra.mxu1 %v1589_v24  ;;  %v1570_v32 = vld [vmem:[%s1849_s15 + $0x58] sm:$0xf0]  ;;  %v1569_v33 = vor.u32 %v1686_v30, %v1568_v29  ;;  %v1560_v35 = vld [vmem:[%s1849_s15 + $0x40] sm:$0xf]  ;;  %v1684_v36 = vld [vmem:[%s1849_s15 + $0x44] sm:$0xf0] }
  0xe5   : > { %v1573_v34 = vor.u32 %v1685_v31, %v1570_v32  ;;  %v1683_v37 = vld [vmem:[%s1849_s15 + $0x44] sm:$0xf]  ;;  %v1562_v38 = vld [vmem:[%s1849_s15 + $0x48] sm:$0xf0]  ;;  %v1561_v39 = vor.u32 %v1684_v36, %v1560_v35  ;;  %v1698_v40 = vld [vmem:[%s1859_s21 + $0x38] sm:$0xff] }
  0xe6   : > { %v1706_v41 = vld [vmem:[%s1859_s21 + $0x78] sm:$0xff]  ;;  %v1565_v42 = vor.u32 %v1683_v37, %v1562_v38  ;;  %v1552_v43 = vld [vmem:[%s1849_s15 + $0x30] sm:$0xf]  ;;  %v1681_v45 = vld [vmem:[%s1849_s15 + $0x34] sm:$0xf]  ;;  %1202 = vmatpush.bf16.msra.mxu2 %v1698_v40 }
  0xe7   : > { %1037 = vmatpush.bf16.msra.mxu0 %v1577_v27  ;;  %v1682_v44 = vld [vmem:[%s1849_s15 + $0x34] sm:$0xf0]  ;;  %v1554_v46 = vld [vmem:[%s1849_s15 + $0x38] sm:$0xf0]  ;;  %1216 = vmatpush.bf16.msra.mxu3 %v1706_v41  ;;  %v1697_v47 = vld [vmem:[%s1859_s21 + $0x30] sm:$0xff] }
  0xe8   : > { %1051 = vmatpush.bf16.msra.mxu1 %v1581_v28  ;;  %v1705_v48 = vld [vmem:[%s1859_s21 + $0x70] sm:$0xff]  ;;  %v1553_v49 = vor.u32 %v1682_v44, %v1552_v43  ;;  %v1557_v50 = vor.u32 %v1681_v45, %v1554_v46  ;;  %v1544_v51 = vld [vmem:[%s1849_s15 + $0x20] sm:$0xf]  ;;  %v1680_v52 = vld [vmem:[%s1849_s15 + $0x24] sm:$0xf0] }
  0xe9   : > { %v1679_v53 = vld [vmem:[%s1849_s15 + $0x24] sm:$0xf]  ;;  %v1546_v54 = vld [vmem:[%s1849_s15 + $0x28] sm:$0xf0]  ;;  %v1545_v57 = vor.u32 %v1680_v52, %v1544_v51  ;;  %v1536_v59 = vld [vmem:[%s1849_s15 + $0x10] sm:$0xf] }
  0xea   : > { %1203 = vmatpush.bf16.msra.mxu2 %v1697_v47  ;;  %v1696_v55 = vld [vmem:[%s1859_s21 + $0x28] sm:$0xff]  ;;  %v1549_v58 = vor.u32 %v1679_v53, %v1546_v54  ;;  %v1678_v60 = vld [vmem:[%s1849_s15 + $0x14] sm:$0xf0]  ;;  %v1677_v61 = vld [vmem:[%s1849_s15 + $0x14] sm:$0xf] }
  0xeb   : > { %1038 = vmatpush.bf16.msra.mxu0 %v1569_v33  ;;  %1217 = vmatpush.bf16.msra.mxu3 %v1705_v48  ;;  %v1704_v56 = vld [vmem:[%s1859_s21 + $0x68] sm:$0xff]  ;;  %v1538_v62 = vld [vmem:[%s1849_s15 + $0x18] sm:$0xf0]  ;;  %v1695_v63 = vld [vmem:[%s1859_s21 + $0x20] sm:$0xff]  ;;  %v1537_v1 = vor.u32 %v1678_v60, %v1536_v59 }
  0xec   : > { %1052 = vmatpush.bf16.msra.mxu1 %v1573_v34  ;;  %v1703_v0 = vld [vmem:[%s1859_s21 + $0x60] sm:$0xff]  ;;  %v1541_v2 = vor.u32 %v1677_v61, %v1538_v62  ;;  %v1676_v4 = vld [vmem:[%s1849_s15 + $0x4] sm:$0xf0]  ;;  %v1530_v6 = vld [vmem:[%s1849_s15 + $0x8] sm:$0xf0] }
  0xed   : > { %v1528_v3 = vld [vmem:[%s1849_s15] sm:$0xf]  ;;  %v1675_v5 = vld [vmem:[%s1849_s15 + $0x4] sm:$0xf]  ;;  %v932_v9 = vld [vmem:[#allocation2 + $0x8] sm:$0xff] }
  0xee   : > { %1204 = vmatpush.bf16.msra.mxu2 %v1696_v55  ;;  %v1529_v7 = vor.u32 %v1676_v4, %v1528_v3  ;;  %v931_v8 = vld [vmem:[#allocation2] sm:$0xff]  ;;  %v1533_v10 = vor.u32 %v1675_v5, %v1530_v6  ;;  %v1694_v12 = vld [vmem:[%s1859_s21 + $0x18] sm:$0xff]  ;;  %v1693_v14 = vld [vmem:[%s1859_s21 + $0x10] sm:$0xff] }
  0xef   : > { %1039 = vmatpush.bf16.msra.mxu0 %v1561_v39  ;;  %1218 = vmatpush.bf16.msra.mxu3 %v1704_v56  ;;  %v933_v11 = vpack.c.bf16 %v932_v9, %v931_v8  ;;  %v1702_v13 = vld [vmem:[%s1859_s21 + $0x58] sm:$0xff]  ;;  %v1701_v15 = vld [vmem:[%s1859_s21 + $0x50] sm:$0xff]  ;;  %v1692_v16 = vld [vmem:[%s1859_s21 + $0x8] sm:$0xff] }
  0xf0   : > { %1053 = vmatpush.bf16.msra.mxu1 %v1565_v42  ;;  %v1700_v17 = vld [vmem:[%s1859_s21 + $0x48] sm:$0xff]  ;;  %v1691_v18 = vld [vmem:[%s1859_s21] sm:$0xff] }
  0xf1   : > { %v1699_v19 = vld [vmem:[%s1859_s21 + $0x40] sm:$0xff] }
  0xf2   : > { %1205 = vmatpush.bf16.msra.mxu2 %v1695_v63  ;;  %v950_v20 = vld [vmem:[%s1854_s18] sm:$0x3] }
  0xf3   : > { %1040 = vmatpush.bf16.msra.mxu0 %v1553_v49  ;;  %1219 = vmatpush.bf16.msra.mxu3 %v1703_v0  ;;  %v952_v23 = vperm.slane %v950_v20, 0  ;;  %v953_v24 = vperm.slane %v950_v20, 1  ;;  %v1718_v37 = vld [vmem:[%s259_s24] ss:$0 sm:$0xff] }
  0xf4   : > { %1054 = vmatpush.bf16.msra.mxu1 %v1557_v50 }
  0xf6   : > { %1206 = vmatpush.bf16.msra.mxu2 %v1694_v12 }
  0xf7   : > { %1041 = vmatpush.bf16.msra.mxu0 %v1545_v57  ;;  %1220 = vmatpush.bf16.msra.mxu3 %v1702_v13 }
  0xf8   : > { %1055 = vmatpush.bf16.msra.mxu1 %v1549_v58 }
  0xfa   : > { %1207 = vmatpush.bf16.msra.mxu2 %v1693_v14 }
  0xfb   : > { %1042 = vmatpush.bf16.msra.mxu0 %v1537_v1  ;;  %1221 = vmatpush.bf16.msra.mxu3 %v1701_v15 }
  0xfc   : > { %1056 = vmatpush.bf16.msra.mxu1 %v1541_v2 }
  0xfe   : > { %1208 = vmatpush.bf16.msra.mxu2 %v1692_v16 }
  0xff   : > { %1043 = vmatpush.bf16.msra.mxu0 %v1529_v7  ;;  %1222 = vmatpush.bf16.msra.mxu3 %v1700_v17 }
 0x100   : > { %1057 = vmatpush.bf16.msra.mxu1 %v1533_v10 }
 0x102   : > { %1044 = vmatmul.bf16.vlgmr.msra.gmra.mxu0 %v933_v11  ;;  %1209 = vmatpush.bf16.msra.mxu2 %v1691_v18 }
 0x103   : > { %1058 = vmatmul.bf16.vlgmr.msra.gmra.mxu1 %v933_v11  ;;  %1223 = vmatpush.bf16.msra.mxu3 %v1699_v19 }
 0x17f   : > { %v1045_v21 = vpop.f32.mrf.mxu0 }
 0x180   : > { %v1059_v22 = vpop.f32.mrf.mxu1  ;;  %v1046_v25 = vadd.f32 %v1045_v21, %v952_v23 }
 0x181   : > { %v1060_v26 = vadd.f32 %v1059_v22, %v953_v24 }
 0x182   : > { %v1064_v31 = vmax.f32 %v1046_v25, 0.0 }
 0x183   : > { %v1065_v33 = vmax.f32 %v1060_v26, 0.0 }
 0x187   : > { %v1047_v27 = vpop.f32.mrf.mxu0 }
 0x188   : > { %v1048_v28 = vadd.f32 %v1047_v27, %v952_v23  ;;  %v1061_v29 = vpop.f32.mrf.mxu1 }
 0x189   : > { %v1062_v30 = vadd.f32 %v1061_v29, %v953_v24 }
 0x18a   : > { %v1066_v32 = vmax.f32 %v1048_v28, 0.0 }
 0x18b   : > { %v1067_v34 = vmax.f32 %v1062_v30, 0.0 }
 0x18c   : > { %v1068_v35 = vpack.c.bf16 %v1066_v32, %v1064_v31 }
 0x18d   : > { %v1069_v36 = vpack.c.bf16 %v1067_v34, %v1065_v33 }
 0x18e   : > { %1210 = vmatmul.bf16.vlgmr.msra.gmra.mxu2 %v1068_v35 }
 0x18f   : > { %1224 = vmatmul.bf16.vlgmr.msra.gmra.mxu3 %v1069_v36 }
 0x211   : > { %v1211_v38 = vpop.f32.mrf.mxu2 }
 0x212   : > { %v1212_v39 = vadd.f32 %v1718_v37, %v1211_v38  ;;  %v1225_v40 = vpop.f32.mrf.mxu3 }
 0x214   : > { %v1226_v41 = vadd.f32 %v1225_v40, %v1212_v39 }
 0x216   : > { %1230 = vst [vmem:[%s1869_s28] sm:$0xff] %v1226_v41 }
 0x219   : > { %v1213_v42 = vpop.f32.mrf.mxu2 }
 0x21a   : > { %v1214_v43 = vadd.f32 %v1718_v37, %v1213_v42  ;;  %v1227_v44 = vpop.f32.mrf.mxu3 }
 0x21c   : > { %v1228_v45 = vadd.f32 %v1227_v44, %v1214_v43 }
 0x21e   : > { %1231 = vst [vmem:[%s1869_s28 + $0x8] sm:$0xff] %v1228_v45 }
 0x21f PF: > { %s30_s9 = sadd.s32 1, %s1783_s9  }
 0x220   : > { %p27_p6 = scmp.ge.s32.totalorder %s30_s9, 6  }
 0x222   :  { %29 = sbr.rel (!%p27_p6) target bundleno = 8 (0x8), region = 688 }
 0x227   :  { %1253 = vsyncmov [#allocation3] }
 0x22a   :  { %s1254_s10 = vpop.sfrf %1253 }
 0x22b   :  { %p1656_p7 = scmp.ne.s32.totalorder %s1254_s10, 0 }
 0x22d   :  { %1258 = shalt.err (%p1656_p7)  }
 0x22e   :  { %1260 = vsyncmov [#allocation3 + $0x1] }
 0x231   :  { %s1261_s21 = vpop.sfrf %1260 }
 0x232   :  { %p1657_p8 = scmp.ne.s32.totalorder %s1261_s21, 0 }
 0x234   :  { %1265 = shalt.err (%p1657_p8)  }
 0x235   :  { %1267 = vsyncmov [#allocation3 + $0x2] }
 0x238   :  { %s1268_s24 = vpop.sfrf %1267 }
 0x239   :  { %p1658_p9 = scmp.ne.s32.totalorder %s1268_s24, 0 }
 0x23b   :  { %1272 = shalt.err (%p1658_p9)  }
 0x23c   :  { %1274 = vsyncmov [#allocation3 + $0x3] }
 0x23f   :  { %s1275_s28 = vpop.sfrf %1274 }
 0x240   :  { %p1659_p10 = scmp.ne.s32.totalorder %s1275_s28, 0 }
 0x242   :  { %1279 = shalt.err (%p1659_p10)  }
 0x243   :  { %1281 = vsyncmov [#allocation3 + $0x4] }
 0x246   :  { %s1282_s29 = vpop.sfrf %1281 }
 0x247   :  { %p1660_p11 = scmp.ne.s32.totalorder %s1282_s29, 0 }
 0x249   :  { %1286 = shalt.err (%p1660_p11)  }
 0x24a   :  { %1288 = vsyncmov [#allocation3 + $0x5] }
 0x24d   :  { %s1289_s2 = vpop.sfrf %1288 }
 0x24e   :  { %p1661_p12 = scmp.ne.s32.totalorder %s1289_s2, 0 }
 0x250   :  { %1293 = shalt.err (%p1661_p12)  }
 0x251   :  { %1295 = vsyncmov [#allocation3 + $0x6] }
 0x254   :  { %s1296_s3 = vpop.sfrf %1295 }
 0x255   :  { %p1662_p13 = scmp.ne.s32.totalorder %s1296_s3, 0 }
 0x257   :  { %1300 = shalt.err (%p1662_p13)  }
 0x258   :  { %1302 = vsyncmov [#allocation3 + $0x7] }
 0x25b   :  { %s1303_s4 = vpop.sfrf %1302 }
 0x25c   :  { %p1663_p0 = scmp.ne.s32.totalorder %s1303_s4, 0 }
 0x25e   :  { %1307 = shalt.err (%p1663_p0)  }
 0x25f   :  { %1309 = vsyncmov [#allocation3 + $0x8] }
 0x262   :  { %s1310_s5 = vpop.sfrf %1309 }
 0x263   :  { %p1664_p1 = scmp.ne.s32.totalorder %s1310_s5, 0 }
 0x265   :  { %1314 = shalt.err (%p1664_p1)  }
 0x266   :  { %1316 = vsyncmov [#allocation3 + $0x9] }
 0x269   :  { %s1317_s6 = vpop.sfrf %1316 }
 0x26a   :  { %p1665_p2 = scmp.ne.s32.totalorder %s1317_s6, 0 }
 0x26c   :  { %1321 = shalt.err (%p1665_p2)  }
 0x26d   :  { %1323 = vsyncmov [#allocation3 + $0xa] }
 0x270   :  { %s1324_s7 = vpop.sfrf %1323 }
 0x271   :  { %p1666_p3 = scmp.ne.s32.totalorder %s1324_s7, 0 }
 0x273   :  { %1328 = shalt.err (%p1666_p3)  }
 0x274   :  { %1330 = vsyncmov [#allocation3 + $0xb] }
 0x277   :  { %s1331_s9 = vpop.sfrf %1330 }
 0x278   :  { %p1667_p4 = scmp.ne.s32.totalorder %s1331_s9, 0 }
 0x27a   :  { %1335 = shalt.err (%p1667_p4)  }
 0x27b   :  { %1337 = vsyncmov [#allocation3 + $0xc] }
 0x27e   :  { %s1338_s20 = vpop.sfrf %1337 }
 0x27f   :  { %p1668_p5 = scmp.ne.s32.totalorder %s1338_s20, 0 }
 0x281   :  { %1342 = shalt.err (%p1668_p5)  }
 0x282   :  { %1344 = vsyncmov [#allocation3 + $0xd] }
 0x285   :  { %s1345_s22 = vpop.sfrf %1344 }
 0x286   :  { %p1669_p6 = scmp.ne.s32.totalorder %s1345_s22, 0 }
 0x288   :  { %1349 = shalt.err (%p1669_p6)  }
 0x289   :  { %1351 = vsyncmov [#allocation3 + $0xe] }
 0x28c   :  { %s1352_s23 = vpop.sfrf %1351 }
 0x28d   :  { %p1670_p7 = scmp.ne.s32.totalorder %s1352_s23, 0 }
 0x28f   :  { %1356 = shalt.err (%p1670_p7)  }
 0x290   :  { %1358 = vsyncmov [#allocation3 + $0xf] }
 0x293   :  { %s1359_s25 = vpop.sfrf %1358 }
 0x294   :  { %p1671_p8 = scmp.ne.s32.totalorder %s1359_s25, 0 }
 0x296   :  { %1363 = shalt.err (%p1671_p8)  }

</bundles_post_ra>
